<compile_context>
chip_gen: v7x
topology: tpu7x:2x2x1
jax: 0.10.0
libtpu: 0.0.40
codegen_flags: <defaults>
</compile_context>

<pallas_src>
import jax
import jax.numpy as jnp
from jax.experimental import pallas as pl
from jax.experimental.pallas import tpu as pltpu  # noqa: F401  (kept for TPU-specific tweaks)

EPS = 1e-5


# ----------------------------- helpers (kernel) -----------------------------

def _bn(h, seg, g, b, relu):
    """Per-view BatchNorm (training mode, biased variance) with affine params.

    `seg` is a (rows, rows) block-averaging matrix: seg @ h broadcasts each
    view's batch mean back to every row of that view, so the statistics are
    computed on the MXU (no cross-sublane reductions).
    """
    mu = jnp.dot(seg, h, preferred_element_type=jnp.float32)
    d = h - mu
    var = jnp.dot(seg, d * d, preferred_element_type=jnp.float32)
    hn = d * jax.lax.rsqrt(var + EPS)
    hn = hn * g + b
    if relu:
        hn = jnp.maximum(hn, 0.0)
    return hn


# ------------------------------- fused kernel -------------------------------

def simsiam_fused_kernel(x_ref, sup_ref, sdn_ref,
                         w1_ref, b1_ref, w2_ref, b2_ref,
                         pool_ref, csum_ref, seg_ref,
                         pw1_ref, pg1_ref, pb1_ref,
                         pw2_ref, pg2_ref, pb2_ref,
                         pw3_ref, pg3_ref, pb3_ref,
                         qw1_ref, qg1_ref, qb1_ref,
                         qw2_ref, qb2_ref,
                         out_ref):
    """Single invocation: conv1 -> conv2 -> GAP -> projector -> predictor
    for BOTH views stacked along the row axis.

    x_ref    : (R, W*Cin)   R = 2*N*H activation rows (lane = w*Cin + ci), f32
    sup_ref  : (R, R) bf16  row-shift "up"  matrix: out[r] = rows[r-1], zero at
                            each image's top row (folds the H padding + mask)
    sdn_ref  : (R, R) bf16  row-shift "down" matrix (bottom rows zeroed)
    w1_ref   : (3, W*Cin, W*C1) bf16   banded conv1 weights (one per kernel row)
    w2_ref   : (3, W*C1, W*C2)  bf16   banded conv2 weights
    b1_ref, b2_ref : (1, W*C1) / (1, W*C2) f32  channel biases tiled over W
    pool_ref : (2N, R) f32   1/(H*W) block row-pool matrix
    csum_ref : (W*C2, C2) f32 tiled identity, sums the W lane groups
    seg_ref  : (2N, 2N) f32  per-view batch-averaging matrix for BN stats
    out_ref  : (2, 2N, dim)  out[0] = p (predictor), out[1] = z (projector)
    """
    f32 = jnp.float32
    bf16 = jnp.bfloat16

    x = x_ref[...]                       # (R, W*Cin) f32
    sup = sup_ref[...]                   # (R, R) bf16
    sdn = sdn_ref[...]                   # (R, R) bf16

    def conv3x3(rows_f32, w_ref, b):
        rows = rows_f32.astype(bf16)
        # center tap (kh = 1) initializes the accumulator (no zeros + add)
        h = jnp.dot(rows, w_ref[1], preferred_element_type=f32)
        # kh = 0 tap needs input row i-1 (zero at each image's top row)
        up = jnp.dot(sup, rows, preferred_element_type=f32).astype(bf16)
        h = h + jnp.dot(up, w_ref[0], preferred_element_type=f32)
        # kh = 2 tap needs input row i+1 (zero at each image's bottom row)
        dn = jnp.dot(sdn, rows, preferred_element_type=f32).astype(bf16)
        h = h + jnp.dot(dn, w_ref[2], preferred_element_type=f32)
        return jnp.maximum(h + b, 0.0)   # bias + ReLU in f32

    h1 = conv3x3(x, w1_ref, b1_ref[...])    # (R, W*C1)
    h2 = conv3x3(h1, w2_ref, b2_ref[...])   # (R, W*C2)

    # global average pooling on the MXU: rows -> per-image, lanes -> C2
    feat = jnp.dot(jnp.dot(pool_ref[...], h2, preferred_element_type=f32),
                   csum_ref[...], preferred_element_type=f32)     # (2N, C2)

    seg = seg_ref[...]

    # ---- projector: [Linear->BN->ReLU] x2 -> Linear->BN ----
    z = jnp.dot(feat, pw1_ref[...], preferred_element_type=f32)
    z = _bn(z, seg, pg1_ref[...], pb1_ref[...], relu=True)
    z = jnp.dot(z, pw2_ref[...], preferred_element_type=f32)
    z = _bn(z, seg, pg2_ref[...], pb2_ref[...], relu=True)
    z = jnp.dot(z, pw3_ref[...], preferred_element_type=f32)
    z = _bn(z, seg, pg3_ref[...], pb3_ref[...], relu=False)

    # ---- predictor: Linear->BN->ReLU -> Linear(+bias) ----
    h = jnp.dot(z, qw1_ref[...], preferred_element_type=f32)
    h = _bn(h, seg, qg1_ref[...], qb1_ref[...], relu=True)
    p = jnp.dot(h, qw2_ref[...], preferred_element_type=f32) + qb2_ref[...]

    out_ref[0, :, :] = p.astype(out_ref.dtype)
    out_ref[1, :, :] = z.astype(out_ref.dtype)


# --------------------------- parameter repacking -----------------------------

def _band_conv_weights(w, width):
    """w: (3, 3, Cin, Cout) HWIO conv weights -> (3, width*Cin, width*Cout).

    Per kernel row kh, a banded matrix mapping one activation row (lane order
    w_in*Cin + ci) to one output row (lane order w_out*Cout + co), with the
    W-direction zero padding folded in (out-of-range taps dropped).
    """
    _, _, cin, cout = w.shape
    win = jnp.arange(width)
    wout = jnp.arange(width)
    mats = []
    for kh in range(3):
        m = jnp.zeros((width, cin, width, cout), jnp.float32)
        for kw in range(3):
            sel = (win[:, None] == (wout[None, :] + kw - 1)).astype(jnp.float32)
            m = m + sel[:, None, :, None] * w[kh, kw][None, :, None, :].astype(jnp.float32)
        mats.append(m.reshape(width * cin, width * cout))
    return jnp.stack(mats, axis=0)


def _pack_params(params, batch, H, W, views=2):
    """One-time host-side repack (hoisted out of the jitted forward)."""
    c1 = params["conv1_w"].shape[3]
    c2 = params["conv2_w"].shape[3]
    vn = views * batch
    R = vn * H
    kp = dict(params)
    # banded conv weights in bf16 (dominant HBM transfer; native MXU dtype)
    kp["w1"] = _band_conv_weights(params["conv1_w"], W).astype(jnp.bfloat16)
    kp["b1"] = jnp.tile(params["conv1_b"].reshape(1, c1), (1, W)).astype(jnp.float32)
    kp["w2"] = _band_conv_weights(params["conv2_w"], W).astype(jnp.bfloat16)
    kp["b2"] = jnp.tile(params["conv2_b"].reshape(1, c2), (1, W)).astype(jnp.float32)
    # row-shift matrices for the +/-1 H taps, with per-image boundary rows
    # zeroed (replaces the padded VMEM scratch and unaligned sublane slices)
    ridx = jnp.arange(R)
    kp["sup"] = ((ridx[:, None] - 1 == ridx[None, :]) &
                 (ridx[:, None] % H != 0)).astype(jnp.bfloat16)
    kp["sdn"] = ((ridx[:, None] + 1 == ridx[None, :]) &
                 (ridx[:, None] % H != H - 1)).astype(jnp.bfloat16)
    # global-average-pool matrices (row pooling + lane channel-sum)
    kp["pool"] = ((jnp.arange(vn)[:, None] == (ridx[None, :] // H))
                  .astype(jnp.float32) / float(H * W))
    kp["csum"] = jnp.tile(jnp.eye(c2, dtype=jnp.float32), (W, 1))
    # per-view batch averaging matrix for BatchNorm statistics
    view_of = jnp.arange(vn) // batch
    kp["seg"] = ((view_of[:, None] == view_of[None, :]).astype(jnp.float32)
                 / float(batch))
    return kp


# ------------------------------ pallas_call glue -----------------------------

def _simsiam_pallas(x_rows, kp, vn, dim):
    """x_rows: (2*N*H, W*Cin) f32.  Returns (p, z) each (2*N, dim)."""
    args = [x_rows, kp["sup"], kp["sdn"],
            kp["w1"], kp["b1"], kp["w2"], kp["b2"],
            kp["pool"], kp["csum"], kp["seg"],
            kp["proj_w1"], kp["proj_g1"], kp["proj_b1"],
            kp["proj_w2"], kp["proj_g2"], kp["proj_b2"],
            kp["proj_w3"], kp["proj_g3"], kp["proj_b3"],
            kp["pred_w1"], kp["pred_g1"], kp["pred_b1"],
            kp["pred_w2"], kp["pred_b2"]]
    # Single invocation (no grid): every array is a full-array VMEM block,
    # fetched exactly once; total VMEM footprint is ~1.5 MiB.
    out = pl.pallas_call(
        simsiam_fused_kernel,
        out_shape=jax.ShapeDtypeStruct((2, vn, dim), jnp.float32),
    )(*args)
    return out[0], out[1]


def simsiam_forward(x1, x2, kp):
    """x1, x2: NCHW float32 images.  Returns (p1, p2, z1.detach(), z2.detach())."""
    N, C, H, W = x1.shape
    dim = kp["proj_w3"].shape[-1]
    x = jnp.concatenate([x1, x2], axis=0)            # (2N, C, H, W)
    x = jnp.transpose(x, (0, 2, 3, 1))               # (2N, H, W, C)
    x_rows = x.reshape(2 * N * H, W * C)             # lane-dense rows (lane = w*C + c)

    p, z = _simsiam_pallas(x_rows, kp, 2 * N, dim)
    p1, p2 = p[:N], p[N:]
    z1, z2 = z[:N], z[N:]
    # .detach() in PyTorch -> stop_gradient in JAX
    return p1, p2, jax.lax.stop_gradient(z1), jax.lax.stop_gradient(z2)


# ------------------------------ parameter init ------------------------------

def init_params(key, cin=4, c1=16, dim=32, pred_dim=16):
    ks = jax.random.split(key, 18)

    def nrm(k, shape, scale=0.1):
        return (scale * jax.random.normal(k, shape)).astype(jnp.float32)

    params = {
        "conv1_w": nrm(ks[0], (3, 3, cin, c1)),
        "conv1_b": nrm(ks[1], (1, c1), 0.01),
        "conv2_w": nrm(ks[2], (3, 3, c1, dim)),
        "conv2_b": nrm(ks[3], (1, dim), 0.01),
        # projector (dim -> dim -> dim -> dim), Linear layers bias-free
        "proj_w1": nrm(ks[4], (dim, dim)),
        "proj_g1": jnp.ones((1, dim), jnp.float32) + nrm(ks[5], (1, dim), 0.01),
        "proj_b1": nrm(ks[6], (1, dim), 0.01),
        "proj_w2": nrm(ks[7], (dim, dim)),
        "proj_g2": jnp.ones((1, dim), jnp.float32) + nrm(ks[8], (1, dim), 0.01),
        "proj_b2": nrm(ks[9], (1, dim), 0.01),
        "proj_w3": nrm(ks[10], (dim, dim)),
        "proj_g3": jnp.ones((1, dim), jnp.float32) + nrm(ks[11], (1, dim), 0.01),
        "proj_b3": nrm(ks[12], (1, dim), 0.01),
        # predictor (dim -> pred_dim -> dim)
        "pred_w1": nrm(ks[13], (dim, pred_dim)),
        "pred_g1": jnp.ones((1, pred_dim), jnp.float32),
        "pred_b1": jnp.zeros((1, pred_dim), jnp.float32),
        "pred_w2": nrm(ks[14], (pred_dim, dim)),
        "pred_b2": jnp.zeros((1, dim), jnp.float32),
    }
    return params


if __name__ == "__main__":
    key = jax.random.PRNGKey(0)
    k1, k2, kparams = jax.random.split(key, 3)

    N, C, H, W = 2, 4, 16, 16
    x1 = jax.random.normal(k1, (N, C, H, W), jnp.float32)   # NCHW, PyTorch convention
    x2 = jax.random.normal(k2, (N, C, H, W), jnp.float32)
    params = init_params(kparams)

    # Repack ONCE on the host (band / shift / pool / seg matrices), outside jit.
    kp = _pack_params(params, N, H, W)

    fwd = jax.jit(lambda a, b: simsiam_forward(a, b, kp))
    p1, p2, z1, z2 = fwd(x1, x2)
    jax.block_until_ready((p1, p2, z1, z2))

    assert p1.shape == (N, 32) and p2.shape == (N, 32)
    assert z1.shape == (N, 32) and z2.shape == (N, 32)
    assert bool(jnp.all(jnp.isfinite(p1))) and bool(jnp.all(jnp.isfinite(p2)))
    assert bool(jnp.all(jnp.isfinite(z1))) and bool(jnp.all(jnp.isfinite(z2)))
    print("KERNEL_OK")
</pallas_src>

<mosaic_0001>
module attributes {stable_mosaic.version = 11 : i64} {
  func.func @simsiam_fused_kernel(%arg0: memref<64x64xf32, #tpu.memory_space<vmem>>, %arg1: memref<64x64xbf16, #tpu.memory_space<vmem>>, %arg2: memref<64x64xbf16, #tpu.memory_space<vmem>>, %arg3: memref<3x64x256xbf16, #tpu.memory_space<vmem>>, %arg4: memref<1x256xf32, #tpu.memory_space<vmem>>, %arg5: memref<3x256x512xbf16, #tpu.memory_space<vmem>>, %arg6: memref<1x512xf32, #tpu.memory_space<vmem>>, %arg7: memref<4x64xf32, #tpu.memory_space<vmem>>, %arg8: memref<512x32xf32, #tpu.memory_space<vmem>>, %arg9: memref<4x4xf32, #tpu.memory_space<vmem>>, %arg10: memref<32x32xf32, #tpu.memory_space<vmem>>, %arg11: memref<1x32xf32, #tpu.memory_space<vmem>>, %arg12: memref<1x32xf32, #tpu.memory_space<vmem>>, %arg13: memref<32x32xf32, #tpu.memory_space<vmem>>, %arg14: memref<1x32xf32, #tpu.memory_space<vmem>>, %arg15: memref<1x32xf32, #tpu.memory_space<vmem>>, %arg16: memref<32x32xf32, #tpu.memory_space<vmem>>, %arg17: memref<1x32xf32, #tpu.memory_space<vmem>>, %arg18: memref<1x32xf32, #tpu.memory_space<vmem>>, %arg19: memref<32x16xf32, #tpu.memory_space<vmem>>, %arg20: memref<1x16xf32, #tpu.memory_space<vmem>>, %arg21: memref<1x16xf32, #tpu.memory_space<vmem>>, %arg22: memref<16x32xf32, #tpu.memory_space<vmem>>, %arg23: memref<1x32xf32, #tpu.memory_space<vmem>>, %arg24: memref<2x4x32xf32, #tpu.memory_space<vmem>>) attributes {dimension_semantics = [], scalar_prefetch = 0 : i64, scratch_operands = 0 : i64, tpu.core_type = #tpu.core_type<tc>} {
    %c0 = arith.constant 0 : index
    %c0_0 = arith.constant 0 : index
    %0 = vector.load %arg0[%c0, %c0_0] : memref<64x64xf32, #tpu.memory_space<vmem>>, vector<64x64xf32>
    %c0_1 = arith.constant 0 : index
    %c0_2 = arith.constant 0 : index
    %1 = vector.load %arg1[%c0_1, %c0_2] : memref<64x64xbf16, #tpu.memory_space<vmem>>, vector<64x64xbf16>
    %c0_3 = arith.constant 0 : index
    %c0_4 = arith.constant 0 : index
    %2 = vector.load %arg2[%c0_3, %c0_4] : memref<64x64xbf16, #tpu.memory_space<vmem>>, vector<64x64xbf16>
    %c0_5 = arith.constant 0 : index
    %c0_6 = arith.constant 0 : index
    %3 = vector.load %arg4[%c0_5, %c0_6] : memref<1x256xf32, #tpu.memory_space<vmem>>, vector<1x256xf32>
    %4 = arith.truncf %0 : vector<64x64xf32> to vector<64x64xbf16>
    %c1 = arith.constant 1 : index
    %c0_7 = arith.constant 0 : index
    %c0_8 = arith.constant 0 : index
    %5 = vector.load %arg3[%c1, %c0_7, %c0_8] : memref<3x64x256xbf16, #tpu.memory_space<vmem>>, vector<1x64x256xbf16>
    %6 = vector.shape_cast %5 : vector<1x64x256xbf16> to vector<64x256xbf16>
    %cst = arith.constant dense<0.000000e+00> : vector<64x256xf32>
    %7 = tpu.matmul %4, %6, %cst {dimension_numbers = #tpu.dot_dimension_numbers<[1], [0], [0], [1], [0, 0, 1, 1], [], []>} : vector<64x64xbf16>, vector<64x256xbf16>, vector<64x256xf32> -> vector<64x256xf32>
    %cst_9 = arith.constant dense<0.000000e+00> : vector<64x64xf32>
    %8 = tpu.matmul %1, %4, %cst_9 {dimension_numbers = #tpu.dot_dimension_numbers<[1], [0], [0], [1], [0, 0, 1, 1], [], []>} : vector<64x64xbf16>, vector<64x64xbf16>, vector<64x64xf32> -> vector<64x64xf32>
    %9 = arith.truncf %8 : vector<64x64xf32> to vector<64x64xbf16>
    %c0_10 = arith.constant 0 : index
    %c0_11 = arith.constant 0 : index
    %c0_12 = arith.constant 0 : index
    %10 = vector.load %arg3[%c0_10, %c0_11, %c0_12] : memref<3x64x256xbf16, #tpu.memory_space<vmem>>, vector<1x64x256xbf16>
    %11 = vector.shape_cast %10 : vector<1x64x256xbf16> to vector<64x256xbf16>
    %cst_13 = arith.constant dense<0.000000e+00> : vector<64x256xf32>
    %12 = tpu.matmul %9, %11, %cst_13 {dimension_numbers = #tpu.dot_dimension_numbers<[1], [0], [0], [1], [0, 0, 1, 1], [], []>} : vector<64x64xbf16>, vector<64x256xbf16>, vector<64x256xf32> -> vector<64x256xf32>
    %13 = arith.addf %7, %12 : vector<64x256xf32>
    %cst_14 = arith.constant dense<0.000000e+00> : vector<64x64xf32>
    %14 = tpu.matmul %2, %4, %cst_14 {dimension_numbers = #tpu.dot_dimension_numbers<[1], [0], [0], [1], [0, 0, 1, 1], [], []>} : vector<64x64xbf16>, vector<64x64xbf16>, vector<64x64xf32> -> vector<64x64xf32>
    %15 = arith.truncf %14 : vector<64x64xf32> to vector<64x64xbf16>
    %c2 = arith.constant 2 : index
    %c0_15 = arith.constant 0 : index
    %c0_16 = arith.constant 0 : index
    %16 = vector.load %arg3[%c2, %c0_15, %c0_16] : memref<3x64x256xbf16, #tpu.memory_space<vmem>>, vector<1x64x256xbf16>
    %17 = vector.shape_cast %16 : vector<1x64x256xbf16> to vector<64x256xbf16>
    %cst_17 = arith.constant dense<0.000000e+00> : vector<64x256xf32>
    %18 = tpu.matmul %15, %17, %cst_17 {dimension_numbers = #tpu.dot_dimension_numbers<[1], [0], [0], [1], [0, 0, 1, 1], [], []>} : vector<64x64xbf16>, vector<64x256xbf16>, vector<64x256xf32> -> vector<64x256xf32>
    %19 = arith.addf %13, %18 : vector<64x256xf32>
    %20 = vector.broadcast %3 : vector<1x256xf32> to vector<64x256xf32>
    %21 = arith.addf %19, %20 : vector<64x256xf32>
    %cst_18 = arith.constant 0.000000e+00 : f32
    %22 = vector.broadcast %cst_18 : f32 to vector<64x256xf32>
    %23 = arith.maximumf %21, %22 : vector<64x256xf32>
    %c0_19 = arith.constant 0 : index
    %c0_20 = arith.constant 0 : index
    %24 = vector.load %arg6[%c0_19, %c0_20] : memref<1x512xf32, #tpu.memory_space<vmem>>, vector<1x512xf32>
    %25 = arith.truncf %23 : vector<64x256xf32> to vector<64x256xbf16>
    %c1_21 = arith.constant 1 : index
    %c0_22 = arith.constant 0 : index
    %c0_23 = arith.constant 0 : index
    %26 = vector.load %arg5[%c1_21, %c0_22, %c0_23] : memref<3x256x512xbf16, #tpu.memory_space<vmem>>, vector<1x256x512xbf16>
    %27 = vector.shape_cast %26 : vector<1x256x512xbf16> to vector<256x512xbf16>
    %cst_24 = arith.constant dense<0.000000e+00> : vector<64x512xf32>
    %28 = tpu.matmul %25, %27, %cst_24 {dimension_numbers = #tpu.dot_dimension_numbers<[1], [0], [0], [1], [0, 0, 1, 1], [], []>} : vector<64x256xbf16>, vector<256x512xbf16>, vector<64x512xf32> -> vector<64x512xf32>
    %cst_25 = arith.constant dense<0.000000e+00> : vector<64x256xf32>
    %29 = tpu.matmul %1, %25, %cst_25 {dimension_numbers = #tpu.dot_dimension_numbers<[1], [0], [0], [1], [0, 0, 1, 1], [], []>} : vector<64x64xbf16>, vector<64x256xbf16>, vector<64x256xf32> -> vector<64x256xf32>
    %30 = arith.truncf %29 : vector<64x256xf32> to vector<64x256xbf16>
    %c0_26 = arith.constant 0 : index
    %c0_27 = arith.constant 0 : index
    %c0_28 = arith.constant 0 : index
    %31 = vector.load %arg5[%c0_26, %c0_27, %c0_28] : memref<3x256x512xbf16, #tpu.memory_space<vmem>>, vector<1x256x512xbf16>
    %32 = vector.shape_cast %31 : vector<1x256x512xbf16> to vector<256x512xbf16>
    %cst_29 = arith.constant dense<0.000000e+00> : vector<64x512xf32>
    %33 = tpu.matmul %30, %32, %cst_29 {dimension_numbers = #tpu.dot_dimension_numbers<[1], [0], [0], [1], [0, 0, 1, 1], [], []>} : vector<64x256xbf16>, vector<256x512xbf16>, vector<64x512xf32> -> vector<64x512xf32>
    %34 = arith.addf %28, %33 : vector<64x512xf32>
    %cst_30 = arith.constant dense<0.000000e+00> : vector<64x256xf32>
    %35 = tpu.matmul %2, %25, %cst_30 {dimension_numbers = #tpu.dot_dimension_numbers<[1], [0], [0], [1], [0, 0, 1, 1], [], []>} : vector<64x64xbf16>, vector<64x256xbf16>, vector<64x256xf32> -> vector<64x256xf32>
    %36 = arith.truncf %35 : vector<64x256xf32> to vector<64x256xbf16>
    %c2_31 = arith.constant 2 : index
    %c0_32 = arith.constant 0 : index
    %c0_33 = arith.constant 0 : index
    %37 = vector.load %arg5[%c2_31, %c0_32, %c0_33] : memref<3x256x512xbf16, #tpu.memory_space<vmem>>, vector<1x256x512xbf16>
    %38 = vector.shape_cast %37 : vector<1x256x512xbf16> to vector<256x512xbf16>
    %cst_34 = arith.constant dense<0.000000e+00> : vector<64x512xf32>
    %39 = tpu.matmul %36, %38, %cst_34 {dimension_numbers = #tpu.dot_dimension_numbers<[1], [0], [0], [1], [0, 0, 1, 1], [], []>} : vector<64x256xbf16>, vector<256x512xbf16>, vector<64x512xf32> -> vector<64x512xf32>
    %40 = arith.addf %34, %39 : vector<64x512xf32>
    %41 = vector.broadcast %24 : vector<1x512xf32> to vector<64x512xf32>
    %42 = arith.addf %40, %41 : vector<64x512xf32>
    %cst_35 = arith.constant 0.000000e+00 : f32
    %43 = vector.broadcast %cst_35 : f32 to vector<64x512xf32>
    %44 = arith.maximumf %42, %43 : vector<64x512xf32>
    %c0_36 = arith.constant 0 : index
    %c0_37 = arith.constant 0 : index
    %45 = vector.load %arg7[%c0_36, %c0_37] : memref<4x64xf32, #tpu.memory_space<vmem>>, vector<4x64xf32>
    %cst_38 = arith.constant dense<0.000000e+00> : vector<4x512xf32>
    %46 = tpu.matmul %45, %44, %cst_38 {dimension_numbers = #tpu.dot_dimension_numbers<[1], [0], [0], [1], [0, 0, 1, 1], [], []>} : vector<4x64xf32>, vector<64x512xf32>, vector<4x512xf32> -> vector<4x512xf32>
    %c0_39 = arith.constant 0 : index
    %c0_40 = arith.constant 0 : index
    %47 = vector.load %arg8[%c0_39, %c0_40] : memref<512x32xf32, #tpu.memory_space<vmem>>, vector<512x32xf32>
    %cst_41 = arith.constant dense<0.000000e+00> : vector<4x32xf32>
    %48 = tpu.matmul %46, %47, %cst_41 {dimension_numbers = #tpu.dot_dimension_numbers<[1], [0], [0], [1], [0, 0, 1, 1], [], []>} : vector<4x512xf32>, vector<512x32xf32>, vector<4x32xf32> -> vector<4x32xf32>
    %c0_42 = arith.constant 0 : index
    %c0_43 = arith.constant 0 : index
    %49 = vector.load %arg9[%c0_42, %c0_43] : memref<4x4xf32, #tpu.memory_space<vmem>>, vector<4x4xf32>
    %c0_44 = arith.constant 0 : index
    %c0_45 = arith.constant 0 : index
    %50 = vector.load %arg10[%c0_44, %c0_45] : memref<32x32xf32, #tpu.memory_space<vmem>>, vector<32x32xf32>
    %cst_46 = arith.constant dense<0.000000e+00> : vector<4x32xf32>
    %51 = tpu.matmul %48, %50, %cst_46 {dimension_numbers = #tpu.dot_dimension_numbers<[1], [0], [0], [1], [0, 0, 1, 1], [], []>} : vector<4x32xf32>, vector<32x32xf32>, vector<4x32xf32> -> vector<4x32xf32>
    %c0_47 = arith.constant 0 : index
    %c0_48 = arith.constant 0 : index
    %52 = vector.load %arg11[%c0_47, %c0_48] : memref<1x32xf32, #tpu.memory_space<vmem>>, vector<1x32xf32>
    %c0_49 = arith.constant 0 : index
    %c0_50 = arith.constant 0 : index
    %53 = vector.load %arg12[%c0_49, %c0_50] : memref<1x32xf32, #tpu.memory_space<vmem>>, vector<1x32xf32>
    %cst_51 = arith.constant dense<0.000000e+00> : vector<4x32xf32>
    %54 = tpu.matmul %49, %51, %cst_51 {dimension_numbers = #tpu.dot_dimension_numbers<[1], [0], [0], [1], [0, 0, 1, 1], [], []>} : vector<4x4xf32>, vector<4x32xf32>, vector<4x32xf32> -> vector<4x32xf32>
    %55 = arith.subf %51, %54 : vector<4x32xf32>
    %56 = arith.mulf %55, %55 : vector<4x32xf32>
    %cst_52 = arith.constant dense<0.000000e+00> : vector<4x32xf32>
    %57 = tpu.matmul %49, %56, %cst_52 {dimension_numbers = #tpu.dot_dimension_numbers<[1], [0], [0], [1], [0, 0, 1, 1], [], []>} : vector<4x4xf32>, vector<4x32xf32>, vector<4x32xf32> -> vector<4x32xf32>
    %cst_53 = arith.constant 9.99999974E-6 : f32
    %58 = vector.broadcast %cst_53 : f32 to vector<4x32xf32>
    %59 = arith.addf %57, %58 : vector<4x32xf32>
    %60 = math.rsqrt %59 : vector<4x32xf32>
    %61 = arith.mulf %55, %60 : vector<4x32xf32>
    %62 = vector.broadcast %52 : vector<1x32xf32> to vector<4x32xf32>
    %63 = arith.mulf %61, %62 : vector<4x32xf32>
    %64 = vector.broadcast %53 : vector<1x32xf32> to vector<4x32xf32>
    %65 = arith.addf %63, %64 : vector<4x32xf32>
    %cst_54 = arith.constant 0.000000e+00 : f32
    %66 = vector.broadcast %cst_54 : f32 to vector<4x32xf32>
    %67 = arith.maximumf %65, %66 : vector<4x32xf32>
    %c0_55 = arith.constant 0 : index
    %c0_56 = arith.constant 0 : index
    %68 = vector.load %arg13[%c0_55, %c0_56] : memref<32x32xf32, #tpu.memory_space<vmem>>, vector<32x32xf32>
    %cst_57 = arith.constant dense<0.000000e+00> : vector<4x32xf32>
    %69 = tpu.matmul %67, %68, %cst_57 {dimension_numbers = #tpu.dot_dimension_numbers<[1], [0], [0], [1], [0, 0, 1, 1], [], []>} : vector<4x32xf32>, vector<32x32xf32>, vector<4x32xf32> -> vector<4x32xf32>
    %c0_58 = arith.constant 0 : index
    %c0_59 = arith.constant 0 : index
    %70 = vector.load %arg14[%c0_58, %c0_59] : memref<1x32xf32, #tpu.memory_space<vmem>>, vector<1x32xf32>
    %c0_60 = arith.constant 0 : index
    %c0_61 = arith.constant 0 : index
    %71 = vector.load %arg15[%c0_60, %c0_61] : memref<1x32xf32, #tpu.memory_space<vmem>>, vector<1x32xf32>
    %cst_62 = arith.constant dense<0.000000e+00> : vector<4x32xf32>
    %72 = tpu.matmul %49, %69, %cst_62 {dimension_numbers = #tpu.dot_dimension_numbers<[1], [0], [0], [1], [0, 0, 1, 1], [], []>} : vector<4x4xf32>, vector<4x32xf32>, vector<4x32xf32> -> vector<4x32xf32>
    %73 = arith.subf %69, %72 : vector<4x32xf32>
    %74 = arith.mulf %73, %73 : vector<4x32xf32>
    %cst_63 = arith.constant dense<0.000000e+00> : vector<4x32xf32>
    %75 = tpu.matmul %49, %74, %cst_63 {dimension_numbers = #tpu.dot_dimension_numbers<[1], [0], [0], [1], [0, 0, 1, 1], [], []>} : vector<4x4xf32>, vector<4x32xf32>, vector<4x32xf32> -> vector<4x32xf32>
    %cst_64 = arith.constant 9.99999974E-6 : f32
    %76 = vector.broadcast %cst_64 : f32 to vector<4x32xf32>
    %77 = arith.addf %75, %76 : vector<4x32xf32>
    %78 = math.rsqrt %77 : vector<4x32xf32>
    %79 = arith.mulf %73, %78 : vector<4x32xf32>
    %80 = vector.broadcast %70 : vector<1x32xf32> to vector<4x32xf32>
    %81 = arith.mulf %79, %80 : vector<4x32xf32>
    %82 = vector.broadcast %71 : vector<1x32xf32> to vector<4x32xf32>
    %83 = arith.addf %81, %82 : vector<4x32xf32>
    %cst_65 = arith.constant 0.000000e+00 : f32
    %84 = vector.broadcast %cst_65 : f32 to vector<4x32xf32>
    %85 = arith.maximumf %83, %84 : vector<4x32xf32>
    %c0_66 = arith.constant 0 : index
    %c0_67 = arith.constant 0 : index
    %86 = vector.load %arg16[%c0_66, %c0_67] : memref<32x32xf32, #tpu.memory_space<vmem>>, vector<32x32xf32>
    %cst_68 = arith.constant dense<0.000000e+00> : vector<4x32xf32>
    %87 = tpu.matmul %85, %86, %cst_68 {dimension_numbers = #tpu.dot_dimension_numbers<[1], [0], [0], [1], [0, 0, 1, 1], [], []>} : vector<4x32xf32>, vector<32x32xf32>, vector<4x32xf32> -> vector<4x32xf32>
    %c0_69 = arith.constant 0 : index
    %c0_70 = arith.constant 0 : index
    %88 = vector.load %arg17[%c0_69, %c0_70] : memref<1x32xf32, #tpu.memory_space<vmem>>, vector<1x32xf32>
    %c0_71 = arith.constant 0 : index
    %c0_72 = arith.constant 0 : index
    %89 = vector.load %arg18[%c0_71, %c0_72] : memref<1x32xf32, #tpu.memory_space<vmem>>, vector<1x32xf32>
    %cst_73 = arith.constant dense<0.000000e+00> : vector<4x32xf32>
    %90 = tpu.matmul %49, %87, %cst_73 {dimension_numbers = #tpu.dot_dimension_numbers<[1], [0], [0], [1], [0, 0, 1, 1], [], []>} : vector<4x4xf32>, vector<4x32xf32>, vector<4x32xf32> -> vector<4x32xf32>
    %91 = arith.subf %87, %90 : vector<4x32xf32>
    %92 = arith.mulf %91, %91 : vector<4x32xf32>
    %cst_74 = arith.constant dense<0.000000e+00> : vector<4x32xf32>
    %93 = tpu.matmul %49, %92, %cst_74 {dimension_numbers = #tpu.dot_dimension_numbers<[1], [0], [0], [1], [0, 0, 1, 1], [], []>} : vector<4x4xf32>, vector<4x32xf32>, vector<4x32xf32> -> vector<4x32xf32>
    %cst_75 = arith.constant 9.99999974E-6 : f32
    %94 = vector.broadcast %cst_75 : f32 to vector<4x32xf32>
    %95 = arith.addf %93, %94 : vector<4x32xf32>
    %96 = math.rsqrt %95 : vector<4x32xf32>
    %97 = arith.mulf %91, %96 : vector<4x32xf32>
    %98 = vector.broadcast %88 : vector<1x32xf32> to vector<4x32xf32>
    %99 = arith.mulf %97, %98 : vector<4x32xf32>
    %100 = vector.broadcast %89 : vector<1x32xf32> to vector<4x32xf32>
    %101 = arith.addf %99, %100 : vector<4x32xf32>
    %c0_76 = arith.constant 0 : index
    %c0_77 = arith.constant 0 : index
    %102 = vector.load %arg19[%c0_76, %c0_77] : memref<32x16xf32, #tpu.memory_space<vmem>>, vector<32x16xf32>
    %cst_78 = arith.constant dense<0.000000e+00> : vector<4x16xf32>
    %103 = tpu.matmul %101, %102, %cst_78 {dimension_numbers = #tpu.dot_dimension_numbers<[1], [0], [0], [1], [0, 0, 1, 1], [], []>} : vector<4x32xf32>, vector<32x16xf32>, vector<4x16xf32> -> vector<4x16xf32>
    %c0_79 = arith.constant 0 : index
    %c0_80 = arith.constant 0 : index
    %104 = vector.load %arg20[%c0_79, %c0_80] : memref<1x16xf32, #tpu.memory_space<vmem>>, vector<1x16xf32>
    %c0_81 = arith.constant 0 : index
    %c0_82 = arith.constant 0 : index
    %105 = vector.load %arg21[%c0_81, %c0_82] : memref<1x16xf32, #tpu.memory_space<vmem>>, vector<1x16xf32>
    %cst_83 = arith.constant dense<0.000000e+00> : vector<4x16xf32>
    %106 = tpu.matmul %49, %103, %cst_83 {dimension_numbers = #tpu.dot_dimension_numbers<[1], [0], [0], [1], [0, 0, 1, 1], [], []>} : vector<4x4xf32>, vector<4x16xf32>, vector<4x16xf32> -> vector<4x16xf32>
    %107 = arith.subf %103, %106 : vector<4x16xf32>
    %108 = arith.mulf %107, %107 : vector<4x16xf32>
    %cst_84 = arith.constant dense<0.000000e+00> : vector<4x16xf32>
    %109 = tpu.matmul %49, %108, %cst_84 {dimension_numbers = #tpu.dot_dimension_numbers<[1], [0], [0], [1], [0, 0, 1, 1], [], []>} : vector<4x4xf32>, vector<4x16xf32>, vector<4x16xf32> -> vector<4x16xf32>
    %cst_85 = arith.constant 9.99999974E-6 : f32
    %110 = vector.broadcast %cst_85 : f32 to vector<4x16xf32>
    %111 = arith.addf %109, %110 : vector<4x16xf32>
    %112 = math.rsqrt %111 : vector<4x16xf32>
    %113 = arith.mulf %107, %112 : vector<4x16xf32>
    %114 = vector.broadcast %104 : vector<1x16xf32> to vector<4x16xf32>
    %115 = arith.mulf %113, %114 : vector<4x16xf32>
    %116 = vector.broadcast %105 : vector<1x16xf32> to vector<4x16xf32>
    %117 = arith.addf %115, %116 : vector<4x16xf32>
    %cst_86 = arith.constant 0.000000e+00 : f32
    %118 = vector.broadcast %cst_86 : f32 to vector<4x16xf32>
    %119 = arith.maximumf %117, %118 : vector<4x16xf32>
    %c0_87 = arith.constant 0 : index
    %c0_88 = arith.constant 0 : index
    %120 = vector.load %arg22[%c0_87, %c0_88] : memref<16x32xf32, #tpu.memory_space<vmem>>, vector<16x32xf32>
    %cst_89 = arith.constant dense<0.000000e+00> : vector<4x32xf32>
    %121 = tpu.matmul %119, %120, %cst_89 {dimension_numbers = #tpu.dot_dimension_numbers<[1], [0], [0], [1], [0, 0, 1, 1], [], []>} : vector<4x16xf32>, vector<16x32xf32>, vector<4x32xf32> -> vector<4x32xf32>
    %c0_90 = arith.constant 0 : index
    %c0_91 = arith.constant 0 : index
    %122 = vector.load %arg23[%c0_90, %c0_91] : memref<1x32xf32, #tpu.memory_space<vmem>>, vector<1x32xf32>
    %123 = vector.broadcast %122 : vector<1x32xf32> to vector<4x32xf32>
    %124 = arith.addf %121, %123 : vector<4x32xf32>
    %c0_92 = arith.constant 0 : index
    %c0_93 = arith.constant 0 : index
    %c0_94 = arith.constant 0 : index
    %125 = vector.load %arg24[%c0_92, %c0_93, %c0_94] : memref<2x4x32xf32, #tpu.memory_space<vmem>>, vector<1x4x32xf32>
    %126 = vector.shape_cast %125 : vector<1x4x32xf32> to vector<4x32xf32>
    %127 = vector.shape_cast %124 : vector<4x32xf32> to vector<1x4x32xf32>
    tpu.vector_store %arg24[%c0_92, %c0_93, %c0_94], %127 {strides = array<i32>} : memref<2x4x32xf32, #tpu.memory_space<vmem>>, vector<1x4x32xf32>,
    %c1_95 = arith.constant 1 : index
    %c0_96 = arith.constant 0 : index
    %c0_97 = arith.constant 0 : index
    %128 = vector.load %arg24[%c1_95, %c0_96, %c0_97] : memref<2x4x32xf32, #tpu.memory_space<vmem>>, vector<1x4x32xf32>
    %129 = vector.shape_cast %128 : vector<1x4x32xf32> to vector<4x32xf32>
    %130 = vector.shape_cast %101 : vector<4x32xf32> to vector<1x4x32xf32>
    tpu.vector_store %arg24[%c1_95, %c0_96, %c0_97], %130 {strides = array<i32>} : memref<2x4x32xf32, #tpu.memory_space<vmem>>, vector<1x4x32xf32>,
    return
  }
}

</mosaic_0001>

<bundles_post_ra>
// kernel: _lambda_.1
= control target key start
LH: loop header
LB: loop body
LE: loop exit
PB: predicated region body
PF: predicated region fallthrough
CT: control target
= control target key end

     0   :  { %vm136_vm0 = vcmask 523264   ;;  %v5317_v28 = vmov 0   ;;  %vm5320_vm1 = vmmov 0   ;;  %vm3005_vm2 = vcmask 261120   ;;  %s6718_s0 = inlined_call_operand.vmem [shape: f32[64,64], index: 0, kind: input, shape index: {}]   ;;  %s6719_s1 = inlined_call_operand.vmem [shape: bf16[64,64], index: 1, kind: input, shape index: {}]   ;;  %s6720_s2 = inlined_call_operand.vmem [shape: bf16[64,64], index: 2, kind: input, shape index: {}]   ;;  %s6721_s3 = inlined_call_operand.vmem [shape: bf16[3,64,256], index: 3, kind: input, shape index: {}]   ;;  %s6722_s5 = inlined_call_operand.vmem [shape: bf16[3,256,512], index: 5, kind: input, shape index: {}]   ;;  %s6723_s4 = inlined_call_operand.vmem [shape: f32[1,256], index: 4, kind: input, shape index: {}]   ;;  %s6724_s6 = inlined_call_operand.vmem [shape: f32[1,512], index: 6, kind: input, shape index: {}]   ;;  %s6725_s8 = inlined_call_operand.vmem [shape: f32[512,32], index: 8, kind: input, shape index: {}]   ;;  %s6726_s7 = inlined_call_operand.vmem [shape: f32[4,64], index: 7, kind: input, shape index: {}]   ;;  %s6727_s10 = inlined_call_operand.vmem [shape: f32[32,32], index: 10, kind: input, shape index: {}]   ;;  %s6728_s9 = inlined_call_operand.vmem [shape: f32[4,4], index: 9, kind: input, shape index: {}]   ;;  %s6729_s13 = inlined_call_operand.vmem [shape: f32[32,32], index: 13, kind: input, shape index: {}]   ;;  %s6730_s11 = inlined_call_operand.vmem [shape: f32[1,32], index: 11, kind: input, shape index: {}]   ;;  %s6731_s12 = inlined_call_operand.vmem [shape: f32[1,32], index: 12, kind: input, shape index: {}]   ;;  %s6732_s16 = inlined_call_operand.vmem [shape: f32[32,32], index: 16, kind: input, shape index: {}]   ;;  %s6733_s14 = inlined_call_operand.vmem [shape: f32[1,32], index: 14, kind: input, shape index: {}]   ;;  %s6734_s15 = inlined_call_operand.vmem [shape: f32[1,32], index: 15, kind: input, shape index: {}]   ;;  %s6735_s19 = inlined_call_operand.vmem [shape: f32[32,16], index: 19, kind: input, shape index: {}]   ;;  %s6736_s17 = inlined_call_operand.vmem [shape: f32[1,32], index: 17, kind: input, shape index: {}]   ;;  %s6737_s18 = inlined_call_operand.vmem [shape: f32[1,32], index: 18, kind: input, shape index: {}]   ;;  %s6738_s24 = inlined_call_operand.vmem [shape: f32[2,4,32], index: 24, kind: output, shape index: {}]   ;;  %s6739_s22 = inlined_call_operand.vmem [shape: f32[16,32], index: 22, kind: input, shape index: {}]   ;;  %s6740_s20 = inlined_call_operand.vmem [shape: f32[1,16], index: 20, kind: input, shape index: {}]   ;;  %s6741_s21 = inlined_call_operand.vmem [shape: f32[1,16], index: 21, kind: input, shape index: {}]   ;;  %s6742_s23 = inlined_call_operand.vmem [shape: f32[1,32], index: 23, kind: input, shape index: {}]  }
   0x1   :  { %6749 = sst [smem:[#allocation2_spill]] %s6718_s0  ;;  %310 = vmatprep.mubr.bf16.mxu1 %v5317_v28  ;;  %vm3085_vm3 = vcmask 1043456   ;;  %vm3081_vm4 = vcmask 31744   ;;  %vm4065_vm5 = vcmask 257024   ;;  %vm3991_vm6 = vcmask 130048  }
   0x2   :  { %6750 = sst [smem:[#allocation3_spill]] %s6719_s1  ;;  %s6758_s27 = sld [smem:[#allocation2_spill]] }
   0x3   :  { %6751 = sst [smem:[#allocation4_spill]] %s6720_s2 }
   0x4   :  { %6752 = sst [smem:[#allocation5_spill]] %s6721_s3 }
   0x5   :  { %6753 = sst [smem:[#allocation6_spill]] %s6722_s5  ;;  %s6761_s5 = sld [smem:[#allocation4_spill]] }
   0x6   :  { %6754 = sst [smem:[#allocation7_spill]] %s6723_s4  ;;  %s6759_s4 = sld [smem:[#allocation3_spill]] }
   0x7   :  { %6755 = sst [smem:[#allocation8_spill]] %s6724_s6  ;;  %s6762_s6 = sld [smem:[#allocation6_spill]] }
   0x8   :  { %6756 = sst [smem:[#allocation9_spill]] %s6725_s8  ;;  %v78_v0 = vld [vmem:[%s6758_s27] sm:$0xff]  ;;  %v79_v1 = vld [vmem:[%s6758_s27 + $0x8] sm:$0xff]  ;;  %v80_v2 = vld [vmem:[%s6758_s27 + $0x10] sm:$0xff]  ;;  %s6760_s8 = sld [smem:[#allocation5_spill]] }
   0x9   :  { %6757 = sst [smem:[#allocation10_spill]] %s6726_s7  ;;  %v5455_v3 = vpack.c.bf16 %v79_v1, %v78_v0  ;;  %v81_v4 = vld [vmem:[%s6758_s27 + $0x18] sm:$0xff]  ;;  %v82_v6 = vld [vmem:[%s6758_s27 + $0x20] sm:$0xff]  ;;  %v83_v7 = vld [vmem:[%s6758_s27 + $0x28] sm:$0xff]  ;;  %s6763_s1 = sld [smem:[#allocation7_spill]] }
   0xa   :  { %v5460_v5 = vpack.c.bf16 %v81_v4, %v80_v2  ;;  %v5476_v9 = vpack.c.bf16 %v83_v7, %v82_v6  ;;  %v84_v10 = vld [vmem:[%s6758_s27 + $0x30] sm:$0xff]  ;;  %v85_v11 = vld [vmem:[%s6758_s27 + $0x38] sm:$0xff]  ;;  %s6764_s29 = sld [smem:[#allocation8_spill]]  ;;  %s6765_s3 = sld [smem:[#allocation9_spill]] }
   0xb   :  { %4627 = vmatprep.subr.bf16.mxu0 %v5455_v3  ;;  %v5488_v12 = vpack.c.bf16 %v85_v11, %v84_v10  ;;  %v4977_v22 = vld [vmem:[%s6761_s5] sm:$0xff]   ;;  %v4978_v23 = vld [vmem:[%s6761_s5 + $0x8] sm:$0xff]   ;;  %v4979_v24 = vld [vmem:[%s6761_s5 + $0x10] sm:$0xff]   ;;  %s6766_s2 = sld [smem:[#allocation10_spill]] }
   0xc   :  { %v5472_v8 = vld [vmem:[%s6759_s4] sm:$0xff]   ;;  %4628 = vmatpush3.bf16.msra.mxu0 %v5455_v3  ;;  %v5504_v16 = vld [vmem:[%s6759_s4 + $0x8] sm:$0xff]   ;;  %v5509_v17 = vld [vmem:[%s6759_s4 + $0x10] sm:$0xff]  }
   0xd   :  { %4629 = vmatprep.subr.bf16.mxu0 %v5460_v5  ;;  %4635 = vmatprep.mubr.msk.bf16.mxu0 %vm136_vm0, %v5472_v8  ;;  %v5531_v21 = vld [vmem:[%s6759_s4 + $0x18] sm:$0xff]  }
   0xe   :  { %v4981_v13 = vld [vmem:[%s6760_s8 + $0x4] ss:$8 sps:$4 sm:$0xff]   ;;  %v4983_v14 = vld [vmem:[%s6760_s8] ss:$8 sps:$4 sm:$0xff]   ;;  %v4984_v15 = vld [vmem:[%s6760_s8 + $0x14] ss:$8 sps:$4 sm:$0xff]  }
   0xf   :  { %278 = vmatprep.subr.bf16.mxu1 %v4981_v13  ;;  %v4986_v18 = vld [vmem:[%s6760_s8 + $0x10] ss:$8 sps:$4 sm:$0xff]   ;;  %v4987_v19 = vld [vmem:[%s6760_s8 + $0x24] ss:$8 sps:$4 sm:$0xff]   ;;  %v4989_v20 = vld [vmem:[%s6760_s8 + $0x20] ss:$8 sps:$4 sm:$0xff]  }
  0x10   :  { %4630 = vmatpush3.bf16.msra.mxu0 %v5460_v5  ;;  %279 = vmatpush1.bf16.msra.mxu1 %v4983_v14  ;;  %v4980_v25 = vld [vmem:[%s6761_s5 + $0x18] sm:$0xff]   ;;  %v4995_v29 = vld [vmem:[%s6760_s8 + $0x44] ss:$8 sps:$4 sm:$0xff]   ;;  %v4993_v35 = vld [vmem:[%s6760_s8 + $0x40] ss:$8 sps:$4 sm:$0xff]  }
  0x11   :  { %4631 = vmatprep.subr.bf16.mxu0 %v5476_v9  ;;  %280 = vmatprep.subr.bf16.mxu1 %v4984_v15  ;;  %v4990_v26 = vld [vmem:[%s6760_s8 + $0x34] ss:$8 sps:$4 sm:$0xff]   ;;  %v4992_v27 = vld [vmem:[%s6760_s8 + $0x30] ss:$8 sps:$4 sm:$0xff]   ;;  %v5001_v40 = vld [vmem:[%s6760_s8 + $0x64] ss:$8 sps:$4 sm:$0xff]  }
  0x12   :  { %v4998_v37 = vld [vmem:[%s6760_s8 + $0x54] ss:$8 sps:$4 sm:$0xff]   ;;  %v4996_v38 = vld [vmem:[%s6760_s8 + $0x50] ss:$8 sps:$4 sm:$0xff]   ;;  %v4999_v45 = vld [vmem:[%s6760_s8 + $0x60] ss:$8 sps:$4 sm:$0xff]  }
  0x13   :  { %v5004_v47 = vld [vmem:[%s6760_s8 + $0x74] ss:$8 sps:$4 sm:$0xff]   ;;  %v5002_v48 = vld [vmem:[%s6760_s8 + $0x70] ss:$8 sps:$4 sm:$0xff]   ;;  %v5007_v49 = vld [vmem:[%s6760_s8 + $0x84] ss:$8 sps:$4 sm:$0xff]  }
  0x14   :  { %4632 = vmatpush3.bf16.msra.mxu0 %v5476_v9  ;;  %281 = vmatpush1.bf16.msra.mxu1 %v4986_v18  ;;  %v5005_v62 = vld [vmem:[%s6760_s8 + $0x80] ss:$8 sps:$4 sm:$0xff]   ;;  %v5010_v63 = vld [vmem:[%s6760_s8 + $0x94] ss:$8 sps:$4 sm:$0xff]   ;;  %v5008_v0 = vld [vmem:[%s6760_s8 + $0x90] ss:$8 sps:$4 sm:$0xff]  }
  0x15   :  { %4633 = vmatprep.subr.bf16.mxu0 %v5488_v12  ;;  %282 = vmatprep.subr.bf16.mxu1 %v4987_v19  ;;  %v5013_v1 = vld [vmem:[%s6760_s8 + $0xa4] ss:$8 sps:$4 sm:$0xff]   ;;  %v5011_v2 = vld [vmem:[%s6760_s8 + $0xa0] ss:$8 sps:$4 sm:$0xff]   ;;  %v5014_v4 = vld [vmem:[%s6760_s8 + $0xb0] ss:$8 sps:$4 sm:$0xff]  }
  0x16   :  { %v5022_v6 = vld [vmem:[%s6762_s6 + $0xc] ss:$16 sps:$4 sm:$0xff]   ;;  %v5026_v7 = vld [vmem:[%s6762_s6 + $0x28] ss:$16 sps:$4 sm:$0xff]  }
  0x17   :  { %v5034_v10 = vld [vmem:[%s6762_s6 + $0x4c] ss:$16 sps:$4 sm:$0xff]   ;;  %v5032_v11 = vld [vmem:[%s6762_s6 + $0x48] ss:$16 sps:$4 sm:$0xff]  }
  0x18   :  { %4634 = vmatpush3.bf16.msra.mxu0 %v5488_v12  ;;  %283 = vmatpush1.bf16.msra.mxu1 %v4989_v20  ;;  %v5038_v13 = vld [vmem:[%s6762_s6 + $0x68] ss:$16 sps:$4 sm:$0xff]   ;;  %v5046_v14 = vld [vmem:[%s6762_s6 + $0x8c] ss:$16 sps:$4 sm:$0xff]  }
  0x19   :  { %4643 = vmatprep.subr.bf16.mxu0 %v5455_v3  ;;  %284 = vmatprep.subr.bf16.mxu1 %v4990_v26  ;;  %v5044_v15 = vld [vmem:[%s6762_s6 + $0x88] ss:$16 sps:$4 sm:$0xff]   ;;  %v5052_v18 = vld [vmem:[%s6762_s6 + $0xac] ss:$16 sps:$4 sm:$0xff]  }
  0x1a   :  { %v5050_v19 = vld [vmem:[%s6762_s6 + $0xa8] ss:$16 sps:$4 sm:$0xff]   ;;  %v5058_v20 = vld [vmem:[%s6762_s6 + $0xcc] ss:$16 sps:$4 sm:$0xff]  }
  0x1b   :  { %4636 = vmatmul.mubr.msk.bf16.vlgmr.msra.gmra.mrb[0].mxu0 %vm136_vm0, %v5504_v16  ;;  %v5068_v26 = vld [vmem:[%s6762_s6 + $0x108] ss:$16 sps:$4 sm:$0xff]  }
  0x1c   :  { %4639 = vmatprep.mubr.msk.bf16.mxu0 %vm136_vm0, %v5509_v17  ;;  %4644 = vmatpush3.bf16.msra.mxu0 %v5455_v3 }
  0x1d   :  { %4645 = vmatprep.subr.bf16.mxu0 %v5460_v5  ;;  %285 = vmatpush1.bf16.msra.mxu1 %v4992_v27  ;;  %v5076_v27 = vld [vmem:[%s6762_s6 + $0x12c] ss:$16 sps:$4 sm:$0xff]  }
  0x1e   :  { %403 = vmatprep.subr.bf16.mxu1 %v4995_v29  ;;  %v5074_v29 = vld [vmem:[%s6762_s6 + $0x128] ss:$16 sps:$4 sm:$0xff]  }
  0x20   :  { %4646 = vmatpush3.bf16.msra.mxu0 %v5460_v5 }
  0x21   :  { %4647 = vmatprep.subr.bf16.mxu0 %v5476_v9 }
  0x23   :  { %4640 = vmatmul.mubr.msk.bf16.gmra.mrb[4].mxu0 %vm136_vm0, %v5531_v21 }
  0x24   :  { %4648 = vmatpush3.bf16.msra.mxu0 %v5476_v9  ;;  %4651 = vmatprep.mubr.msk.bf16.mxu0 %vm136_vm0, %v4977_v22  ;;  %v5056_v22 = vld [vmem:[%s6762_s6 + $0xc8] ss:$16 sps:$4 sm:$0xff]  }
  0x25   :  { %4649 = vmatprep.subr.bf16.mxu0 %v5488_v12 }
  0x28   :  { %4650 = vmatpush3.bf16.msra.mxu0 %v5488_v12 }
  0x2b   :  { %4652 = vmatmul.mubr.msk.bf16.vlgmr.msra.gmra.mrb[8].mxu0 %vm136_vm0, %v4978_v23  ;;  %v5064_v23 = vld [vmem:[%s6762_s6 + $0xec] ss:$16 sps:$4 sm:$0xff]  }
  0x2c   :  { %4655 = vmatprep.mubr.msk.bf16.mxu0 %vm136_vm0, %v4979_v24  ;;  %v5062_v24 = vld [vmem:[%s6762_s6 + $0xe8] ss:$16 sps:$4 sm:$0xff]  }
  0x33   :  { %4656 = vmatmul.mubr.msk.bf16.gmra.mrb[12].mxu0 %vm136_vm0, %v4980_v25  ;;  %v5070_v25 = vld [vmem:[%s6762_s6 + $0x10c] ss:$16 sps:$4 sm:$0xff]  }
  0x34   :  { %876 = vmatprep.mubr.bf16.mxu0 %v5317_v28 }
  0xee   :  { %v4637_v30 = vpop.f32.mrb[0].mxu0 }
  0xef   :  { %v183_v31 = vpop.f32.mrb[1].mxu0 }
  0xf0   :  { %v4638_v32 = vpop.f32.mrb[2].mxu0 }
  0xf1   :  { %v215_v33 = vpack.c.bf16 %v4638_v32, %v4637_v30  ;;  %v186_v34 = vpop.f32.mrb[3].mxu0  ;;  %v5082_v30 = vld [vmem:[%s6762_s6 + $0x14c] ss:$16 sps:$4 sm:$0xff]  }
  0xf2   :  { %v214_v36 = vpack.c.bf16 %v186_v34, %v183_v31  ;;  %v5080_v31 = vld [vmem:[%s6762_s6 + $0x148] ss:$16 sps:$4 sm:$0xff]   ;;  %v5088_v32 = vld [vmem:[%s6762_s6 + $0x16c] ss:$16 sps:$4 sm:$0xff]  }
  0xf3   :  { %v5094_v34 = vld [vmem:[%s6762_s6 + $0x18c] ss:$16 sps:$4 sm:$0xff]  }
  0xf4   :  { %4097 = vmatmul.mubr.msk.bf16.vlgmr.msra.gmra.mrb[0].mxu1 %vm136_vm0, %v214_v36  ;;  %v5100_v36 = vld [vmem:[%s6762_s6 + $0x1ac] ss:$16 sps:$4 sm:$0xff]  }
  0xf5   :  { %404 = vmatpush1.bf16.msra.mxu1 %v4993_v35  ;;  %320 = vmatprep.mubr.bf16.mxu1 %v5317_v28  ;;  %v5092_v35 = vld [vmem:[%s6762_s6 + $0x188] ss:$16 sps:$4 sm:$0xff]  }
  0xf6   :  { %v4641_v39 = vpop.f32.mrb[4].mxu0  ;;  %405 = vmatprep.subr.bf16.mxu1 %v4998_v37  ;;  %v728_v37 = vlaneseq }
  0xf7   :  { %v199_v41 = vpop.f32.mrb[5].mxu0 }
  0xf8   :  { %v4642_v42 = vpop.f32.mrb[6].mxu0 }
  0xf9   :  { %v217_v43 = vpack.c.bf16 %v4642_v42, %v4641_v39  ;;  %v202_v44 = vpop.f32.mrb[7].mxu0  ;;  %406 = vmatpush1.bf16.msra.mxu1 %v4996_v38  ;;  %v5098_v38 = vld [vmem:[%s6762_s6 + $0x1a8] ss:$16 sps:$4 sm:$0xff]   ;;  %v5106_v39 = vld [vmem:[%s6762_s6 + $0x1cc] ss:$16 sps:$4 sm:$0xff]  }
  0xfa   :  { %v216_v46 = vpack.c.bf16 %v202_v44, %v199_v41  ;;  %407 = vmatprep.subr.bf16.mxu1 %v5001_v40  ;;  %v5726_v40 = vshrl.u32 %v728_v37, 7  ;;  %v5104_v41 = vld [vmem:[%s6762_s6 + $0x1c8] ss:$16 sps:$4 sm:$0xff]   ;;  %v102_v42 = vld [vmem:[%s6763_s1] sm:$0x3] }
  0xfc   :  { %4098 = vmatmul.mubr.msk.bf16.gmra.mrb[4].mxu1 %vm136_vm0, %v215_v33  ;;  %v5086_v33 = vld [vmem:[%s6762_s6 + $0x168] ss:$16 sps:$4 sm:$0xff]   ;;  %v734_v44 = vsub.s32 1, %v5726_v40 }
  0xfd   :  { %330 = vmatprep.mubr.bf16.mxu1 %v5317_v28  ;;  %408 = vmatpush1.bf16.msra.mxu1 %v4999_v45 }
  0xfe   :  { %409 = vmatprep.subr.bf16.mxu1 %v5004_v47  ;;  %v4653_v50 = vpop.f32.mrb[8].mxu0 }
  0xff   :  { %v542_v51 = vpop.f32.mrb[9].mxu0 }
 0x100   :  { %v4654_v52 = vpop.f32.mrb[10].mxu0 }
 0x101   :  { %410 = vmatpush1.bf16.msra.mxu1 %v5002_v48  ;;  %v574_v53 = vpack.c.bf16 %v4654_v52, %v4653_v50  ;;  %v545_v54 = vpop.f32.mrb[11].mxu0 }
 0x102   :  { %638 = vmatprep.subr.bf16.mxu1 %v5007_v49  ;;  %v573_v55 = vpack.c.bf16 %v545_v54, %v542_v51 }
 0x104   :  { %4099 = vmatmul.mubr.msk.bf16.gmra.mrb[8].mxu1 %vm136_vm0, %v216_v46  ;;  %v735_v46 = vrot.slane %v102_v42, %v734_v44 }
 0x105   :  { %340 = vmatprep.mubr.bf16.mxu1 %v5317_v28 }
 0x106   :  { %v4657_v56 = vpop.f32.mrb[12].mxu0 }
 0x107   :  { %v558_v57 = vpop.f32.mrb[13].mxu0 }
 0x108   :  { %v4658_v58 = vpop.f32.mrb[14].mxu0 }
 0x109   :  { %v576_v59 = vpack.c.bf16 %v4658_v58, %v4657_v56  ;;  %v561_v60 = vpop.f32.mrb[15].mxu0 }
 0x10a   :  { %v575_v61 = vpack.c.bf16 %v561_v60, %v558_v57 }
 0x10c   :  { %4100 = vmatmul.mubr.msk.bf16.gmra.mrb[12].mxu1 %vm136_vm0, %v217_v43  ;;  %v730_v43 = vsub.s32 0, %v5726_v40 }
 0x10d   :  { %435 = vmatprep.mubr.bf16.mxu1 %v5317_v28 }
 0x10e   :  { %v731_v45 = vrot.slane %v102_v42, %v730_v43 }
 0x114   :  { %4109 = vmatmul.mubr.msk.bf16.vlgmr.msra.gmra.mrb[0].mxu1 %vm136_vm0, %v5455_v3  ;;  %v5016_v3 = vld [vmem:[%s6760_s8 + $0xb4] ss:$8 sps:$4 sm:$0xff]  }
 0x115   :  { %639 = vmatpush1.bf16.msra.mxu1 %v5005_v62  ;;  %445 = vmatprep.mubr.bf16.mxu1 %v5317_v28 }
 0x116   :  { %640 = vmatprep.subr.bf16.mxu1 %v5010_v63 }
 0x119   :  { %641 = vmatpush1.bf16.msra.mxu1 %v5008_v0 }
 0x11a   :  { %642 = vmatprep.subr.bf16.mxu1 %v5013_v1 }
 0x11c   :  { %4110 = vmatmul.mubr.msk.bf16.gmra.mrb[4].mxu1 %vm136_vm0, %v5460_v5  ;;  %v5020_v5 = vld [vmem:[%s6762_s6 + $0x8] ss:$16 sps:$4 sm:$0xff]  }
 0x11d   :  { %455 = vmatprep.mubr.bf16.mxu1 %v5317_v28  ;;  %643 = vmatpush1.bf16.msra.mxu1 %v5011_v2 }
 0x11e   :  { %644 = vmatprep.subr.bf16.mxu1 %v5016_v3 }
 0x121   :  { %645 = vmatpush1.bf16.msra.mxu1 %v5014_v4 }
 0x122   :  { %1382 = vmatprep.subr.bf16.mxu1 %v5022_v6 }
 0x124   :  { %4111 = vmatmul.mubr.msk.bf16.gmra.mrb[8].mxu1 %vm136_vm0, %v5476_v9  ;;  %v5028_v9 = vld [vmem:[%s6762_s6 + $0x2c] ss:$16 sps:$4 sm:$0xff]  }
 0x125   :  { %465 = vmatprep.mubr.bf16.mxu1 %v5317_v28 }
 0x12c   :  { %4112 = vmatmul.mubr.msk.bf16.gmra.mrb[12].mxu1 %vm136_vm0, %v5488_v12  ;;  %v5040_v12 = vld [vmem:[%s6762_s6 + $0x6c] ss:$16 sps:$4 sm:$0xff]  }
 0x12d   :  { %670 = vmatprep.mubr.bf16.mxu1 %v5317_v28 }
 0x134   :  { %4137 = vmatmul.mubr.msk.bf16.vlgmr.msra.gmra.mrb[0].mxu1 %vm136_vm0, %v573_v55 }
 0x135   :  { %680 = vmatprep.mubr.bf16.mxu1 %v5317_v28  ;;  %1383 = vmatpush1.bf16.msra.mxu1 %v5020_v5 }
 0x136   :  { %1384 = vmatprep.subr.bf16.mxu1 %v5028_v9 }
 0x139   :  { %1385 = vmatpush1.bf16.msra.mxu1 %v5026_v7 }
 0x13a   :  { %1386 = vmatprep.subr.bf16.mxu1 %v5034_v10 }
 0x13c   :  { %4138 = vmatmul.mubr.msk.bf16.gmra.mrb[4].mxu1 %vm136_vm0, %v574_v53 }
 0x13d   :  { %690 = vmatprep.mubr.bf16.mxu1 %v5317_v28  ;;  %1387 = vmatpush1.bf16.msra.mxu1 %v5032_v11 }
 0x13e   :  { %1388 = vmatprep.subr.bf16.mxu1 %v5040_v12 }
 0x141   :  { %1389 = vmatpush1.bf16.msra.mxu1 %v5038_v13 }
 0x142   :  { %1390 = vmatprep.subr.bf16.mxu1 %v5046_v14 }
 0x144   :  { %4139 = vmatmul.mubr.msk.bf16.gmra.mrb[8].mxu1 %vm136_vm0, %v575_v61 }
 0x145   :  { %700 = vmatprep.mubr.bf16.mxu1 %v5317_v28  ;;  %1391 = vmatpush1.bf16.msra.mxu1 %v5044_v15 }
 0x146   :  { %1392 = vmatprep.subr.bf16.mxu1 %v5052_v18 }
 0x149   :  { %1393 = vmatpush1.bf16.msra.mxu1 %v5050_v19 }
 0x14a   :  { %1394 = vmatprep.subr.bf16.mxu1 %v5058_v20 }
 0x14c   :  { %4140 = vmatmul.mubr.msk.bf16.gmra.mrb[12].mxu1 %vm136_vm0, %v576_v59 }
 0x14d   :  { %1395 = vmatpush1.bf16.msra.mxu1 %v5056_v22 }
 0x14e   :  { %1396 = vmatprep.subr.bf16.mxu1 %v5064_v23 }
 0x151   :  { %1397 = vmatpush1.bf16.msra.mxu1 %v5062_v24 }
 0x152   :  { %1398 = vmatprep.subr.bf16.mxu1 %v5070_v25 }
 0x155   :  { %1399 = vmatpush1.bf16.msra.mxu1 %v5068_v26 }
 0x156   :  { %1400 = vmatprep.subr.bf16.mxu1 %v5076_v27 }
 0x159   :  { %1401 = vmatpush1.bf16.msra.mxu1 %v5074_v29 }
 0x15a   :  { %1402 = vmatprep.subr.bf16.mxu1 %v5082_v30 }
 0x15d   :  { %1403 = vmatpush1.bf16.msra.mxu1 %v5080_v31 }
 0x15e   :  { %1404 = vmatprep.subr.bf16.mxu1 %v5088_v32 }
 0x161   :  { %1405 = vmatpush1.bf16.msra.mxu1 %v5086_v33 }
 0x162   :  { %1406 = vmatprep.subr.bf16.mxu1 %v5094_v34 }
 0x165   :  { %1407 = vmatpush1.bf16.msra.mxu1 %v5092_v35 }
 0x166   :  { %1408 = vmatprep.subr.bf16.mxu1 %v5100_v36 }
 0x169   :  { %1409 = vmatpush1.bf16.msra.mxu1 %v5098_v38 }
 0x16a   :  { %1410 = vmatprep.subr.bf16.mxu1 %v5106_v39 }
 0x16d   :  { %1411 = vmatpush1.bf16.msra.mxu1 %v5104_v41 }
 0x207   :  { %v672_v47 = vpop.f32.mrb[0].mxu1 }
 0x208   :  { %v738_v48 = vadd.f32 %v731_v45, %v672_v47  ;;  %v674_v49 = vpop.f32.mrb[1].mxu1 }
 0x209   :  { %v739_v50 = vadd.f32 %v735_v46, %v674_v49  ;;  %v676_v51 = vpop.f32.mrb[2].mxu1  ;;  %v5019_v49 = vld [vmem:[%s6762_s6 + $0x4] ss:$16 sps:$4 sm:$0xff]  }
 0x20a   :  { %v740_v52 = vadd.f32 %v731_v45, %v676_v51  ;;  %v678_v53 = vpop.f32.mrb[3].mxu1  ;;  %v754_v55 = vmax.f32 %v738_v48, 0.0  ;;  %v5031_v51 = vld [vmem:[%s6762_s6 + $0x44] ss:$16 sps:$4 sm:$0xff]  }
 0x20b   :  { %v741_v54 = vadd.f32 %v735_v46, %v678_v53  ;;  %v755_v57 = vmax.f32 %v739_v50, 0.0  ;;  %v5023_v50 = vld [vmem:[%s6762_s6 + $0x20] ss:$16 sps:$4 sm:$0xff]  }
 0x20c   :  { %v756_v56 = vmax.f32 %v740_v52, 0.0  ;;  %v5029_v52 = vld [vmem:[%s6762_s6 + $0x40] ss:$16 sps:$4 sm:$0xff]  }
 0x20d   :  { %v757_v58 = vmax.f32 %v741_v54, 0.0  ;;  %v5035_v53 = vld [vmem:[%s6762_s6 + $0x60] ss:$16 sps:$4 sm:$0xff]   ;;  %v5043_v54 = vld [vmem:[%s6762_s6 + $0x84] ss:$16 sps:$4 sm:$0xff]  }
 0x20e   :  { %v5740_v59 = vpack.c.bf16 %v756_v56, %v754_v55  ;;  %v5041_v55 = vld [vmem:[%s6762_s6 + $0x80] ss:$16 sps:$4 sm:$0xff]  }
 0x20f   :  { %v5742_v60 = vpack.c.bf16 %v757_v58, %v755_v57  ;;  %v682_v61 = vpop.f32.mrb[4].mxu1  ;;  %v5047_v56 = vld [vmem:[%s6762_s6 + $0xa0] ss:$16 sps:$4 sm:$0xff]   ;;  %v5055_v57 = vld [vmem:[%s6762_s6 + $0xc4] ss:$16 sps:$4 sm:$0xff]  }
 0x210   :  { %v742_v62 = vadd.f32 %v731_v45, %v682_v61  ;;  %v684_v63 = vpop.f32.mrb[5].mxu1  ;;  %v5053_v58 = vld [vmem:[%s6762_s6 + $0xc0] ss:$16 sps:$4 sm:$0xff]  }
 0x211   :  { %v743_v0 = vadd.f32 %v735_v46, %v684_v63  ;;  %v686_v1 = vpop.f32.mrb[6].mxu1  ;;  %844 = vmatprep.subr.bf16.mxu0 %v5742_v60  ;;  %v5059_v61 = vld [vmem:[%s6762_s6 + $0xe0] ss:$16 sps:$4 sm:$0xff]  }
 0x212   :  { %v744_v2 = vadd.f32 %v731_v45, %v686_v1  ;;  %v688_v3 = vpop.f32.mrb[7].mxu1  ;;  %845 = vmatpush1.bf16.msra.mxu0 %v5740_v59  ;;  %v758_v5 = vmax.f32 %v742_v62, 0.0  ;;  %v5067_v62 = vld [vmem:[%s6762_s6 + $0x104] ss:$16 sps:$4 sm:$0xff]   ;;  %v5065_v63 = vld [vmem:[%s6762_s6 + $0x100] ss:$16 sps:$4 sm:$0xff]  }
 0x213   :  { %v745_v4 = vadd.f32 %v735_v46, %v688_v3  ;;  %v759_v7 = vmax.f32 %v743_v0, 0.0  ;;  %v5071_v0 = vld [vmem:[%s6762_s6 + $0x120] ss:$16 sps:$4 sm:$0xff]   ;;  %v5079_v1 = vld [vmem:[%s6762_s6 + $0x144] ss:$16 sps:$4 sm:$0xff]  }
 0x214   :  { %v760_v6 = vmax.f32 %v744_v2, 0.0  ;;  %v5077_v2 = vld [vmem:[%s6762_s6 + $0x140] ss:$16 sps:$4 sm:$0xff]   ;;  %v5085_v3 = vld [vmem:[%s6762_s6 + $0x164] ss:$16 sps:$4 sm:$0xff]  }
 0x215   :  { %v761_v9 = vmax.f32 %v745_v4, 0.0  ;;  %v5083_v4 = vld [vmem:[%s6762_s6 + $0x160] ss:$16 sps:$4 sm:$0xff]  }
 0x216   :  { %v5746_v10 = vpack.c.bf16 %v760_v6, %v758_v5  ;;  %v5091_v5 = vld [vmem:[%s6762_s6 + $0x184] ss:$16 sps:$4 sm:$0xff]   ;;  %v5089_v6 = vld [vmem:[%s6762_s6 + $0x180] ss:$16 sps:$4 sm:$0xff]  }
 0x217   :  { %v5748_v11 = vpack.c.bf16 %v761_v9, %v759_v7  ;;  %v692_v12 = vpop.f32.mrb[8].mxu1  ;;  %v5097_v7 = vld [vmem:[%s6762_s6 + $0x1a4] ss:$16 sps:$4 sm:$0xff]   ;;  %v5095_v9 = vld [vmem:[%s6762_s6 + $0x1a0] ss:$16 sps:$4 sm:$0xff]  }
 0x218   :  { %v746_v13 = vadd.f32 %v731_v45, %v692_v12  ;;  %v694_v14 = vpop.f32.mrb[9].mxu1  ;;  %v5103_v12 = vld [vmem:[%s6762_s6 + $0x1c4] ss:$16 sps:$4 sm:$0xff]  }
 0x219   :  { %v747_v15 = vadd.f32 %v735_v46, %v694_v14  ;;  %v696_v18 = vpop.f32.mrb[10].mxu1  ;;  %846 = vmatprep.subr.bf16.mxu0 %v5748_v11  ;;  %v5109_v14 = vld [vmem:[%s6762_s6 + $0x1e4] ss:$16 sps:$4 sm:$0xff]  }
 0x21a   :  { %v748_v19 = vadd.f32 %v731_v45, %v696_v18  ;;  %v698_v20 = vpop.f32.mrb[11].mxu1  ;;  %847 = vmatpush1.bf16.msra.mxu0 %v5746_v10  ;;  %v762_v23 = vmax.f32 %v746_v13, 0.0  ;;  %v5101_v13 = vld [vmem:[%s6762_s6 + $0x1c0] ss:$16 sps:$4 sm:$0xff]  }
 0x21b   :  { %v749_v22 = vadd.f32 %v735_v46, %v698_v20  ;;  %v763_v25 = vmax.f32 %v747_v15, 0.0  ;;  %v5112_v15 = vld [vmem:[%s6762_s6 + $0x1ec] ss:$16 sps:$4 sm:$0xff]   ;;  %v5107_v18 = vld [vmem:[%s6762_s6 + $0x1e0] ss:$16 sps:$4 sm:$0xff]  }
 0x21c   :  { %v764_v24 = vmax.f32 %v748_v19, 0.0  ;;  %v5110_v19 = vld [vmem:[%s6762_s6 + $0x1e8] ss:$16 sps:$4 sm:$0xff]   ;;  %1412 = vmatprep.subr.bf16.mxu1 %v5112_v15  ;;  %v5115_v20 = vld [vmem:[%s6762_s6 + $0x204] ss:$16 sps:$4 sm:$0xff]  }
 0x21d   :  { %v765_v26 = vmax.f32 %v749_v22, 0.0  ;;  %1413 = vmatpush1.bf16.msra.mxu1 %v5110_v19  ;;  %v5118_v22 = vld [vmem:[%s6762_s6 + $0x20c] ss:$16 sps:$4 sm:$0xff]   ;;  %v5152_v19 = vld [vmem:[%s6762_s6 + $0x2c8] ss:$16 sps:$4 sm:$0xff]  }
 0x21e   :  { %v5752_v27 = vpack.c.bf16 %v764_v24, %v762_v23  ;;  %1848 = vmatprep.subr.bf16.mxu1 %v5118_v22  ;;  %v5160_v22 = vld [vmem:[%s6762_s6 + $0x2ec] ss:$16 sps:$4 sm:$0xff]  }
 0x21f   :  { %v5754_v29 = vpack.c.bf16 %v765_v26, %v763_v25  ;;  %v702_v30 = vpop.f32.mrb[12].mxu1 }
 0x220   :  { %v750_v31 = vadd.f32 %v731_v45, %v702_v30  ;;  %v704_v32 = vpop.f32.mrb[13].mxu1 }
 0x221   :  { %v751_v33 = vadd.f32 %v735_v46, %v704_v32  ;;  %v706_v34 = vpop.f32.mrb[14].mxu1  ;;  %848 = vmatprep.subr.bf16.mxu0 %v5754_v29  ;;  %v5113_v32 = vld [vmem:[%s6762_s6 + $0x200] ss:$16 sps:$4 sm:$0xff]  }
 0x222   :  { %v752_v35 = vadd.f32 %v731_v45, %v706_v34  ;;  %v708_v36 = vpop.f32.mrb[15].mxu1  ;;  %849 = vmatpush1.bf16.msra.mxu0 %v5752_v27  ;;  %v766_v38 = vmax.f32 %v750_v31, 0.0  ;;  %v5017_v45 = vld [vmem:[%s6762_s6] ss:$16 sps:$4 sm:$0xff]   ;;  %v5121_v34 = vld [vmem:[%s6762_s6 + $0x224] ss:$16 sps:$4 sm:$0xff]  }
 0x223   :  { %v753_v37 = vadd.f32 %v735_v46, %v708_v36  ;;  %v767_v41 = vmax.f32 %v751_v33, 0.0  ;;  %v5025_v46 = vld [vmem:[%s6762_s6 + $0x24] ss:$16 sps:$4 sm:$0xff]   ;;  %v5116_v33 = vld [vmem:[%s6762_s6 + $0x208] ss:$16 sps:$4 sm:$0xff]  }
 0x224   :  { %v768_v39 = vmax.f32 %v752_v35, 0.0  ;;  %v5124_v35 = vld [vmem:[%s6762_s6 + $0x22c] ss:$16 sps:$4 sm:$0xff]  }
 0x225   :  { %v769_v42 = vmax.f32 %v753_v37, 0.0  ;;  %v5119_v37 = vld [vmem:[%s6762_s6 + $0x220] ss:$16 sps:$4 sm:$0xff]  }
 0x226   :  { %v5758_v47 = vpack.c.bf16 %v768_v39, %v766_v38  ;;  %v5122_v38 = vld [vmem:[%s6762_s6 + $0x228] ss:$16 sps:$4 sm:$0xff]  }
 0x227   :  { %v5760_v48 = vpack.c.bf16 %v769_v42, %v767_v41  ;;  %v5127_v41 = vld [vmem:[%s6762_s6 + $0x244] ss:$16 sps:$4 sm:$0xff]   ;;  %v5130_v42 = vld [vmem:[%s6762_s6 + $0x24c] ss:$16 sps:$4 sm:$0xff]  }
 0x229   :  { %850 = vmatprep.subr.bf16.mxu0 %v5760_v48 }
 0x22a   :  { %851 = vmatpush1.bf16.msra.mxu0 %v5758_v47 }
 0x22b   :  { %1309 = vmatprep.subr.bf16.mxu0 %v5019_v49 }
 0x22d   :  { %4205 = vmatmul.mubr.msk.bf16.vlgmr.msra.gmra.mrb[16].mxu0 %vm136_vm0, %v5472_v8  ;;  %v5037_v8 = vld [vmem:[%s6762_s6 + $0x64] ss:$16 sps:$4 sm:$0xff]  }
 0x22e   :  { %886 = vmatprep.mubr.bf16.mxu0 %v5317_v28  ;;  %1310 = vmatpush1.bf16.msra.mxu0 %v5017_v45 }
 0x22f   :  { %1311 = vmatprep.subr.bf16.mxu0 %v5025_v46 }
 0x232   :  { %1312 = vmatpush1.bf16.msra.mxu0 %v5023_v50 }
 0x233   :  { %1313 = vmatprep.subr.bf16.mxu0 %v5031_v51  ;;  %v5125_v51 = vld [vmem:[%s6762_s6 + $0x240] ss:$16 sps:$4 sm:$0xff]  }
 0x235   :  { %4206 = vmatmul.mubr.msk.bf16.gmra.mrb[20].mxu0 %vm136_vm0, %v5504_v16  ;;  %v5049_v16 = vld [vmem:[%s6762_s6 + $0xa4] ss:$16 sps:$4 sm:$0xff]  }
 0x236   :  { %896 = vmatprep.mubr.bf16.mxu0 %v5317_v28  ;;  %1314 = vmatpush1.bf16.msra.mxu0 %v5029_v52  ;;  %v5128_v52 = vld [vmem:[%s6762_s6 + $0x248] ss:$16 sps:$4 sm:$0xff]  }
 0x237   :  { %1315 = vmatprep.subr.bf16.mxu0 %v5037_v8  ;;  %v5133_v8 = vld [vmem:[%s6762_s6 + $0x264] ss:$16 sps:$4 sm:$0xff]  }
 0x23a   :  { %1316 = vmatpush1.bf16.msra.mxu0 %v5035_v53  ;;  %v5136_v53 = vld [vmem:[%s6762_s6 + $0x26c] ss:$16 sps:$4 sm:$0xff]  }
 0x23b   :  { %1317 = vmatprep.subr.bf16.mxu0 %v5043_v54 }
 0x23d   :  { %4207 = vmatmul.mubr.msk.bf16.gmra.mrb[24].mxu0 %vm136_vm0, %v5509_v17  ;;  %v5061_v17 = vld [vmem:[%s6762_s6 + $0xe4] ss:$16 sps:$4 sm:$0xff]  }
 0x23e   :  { %906 = vmatprep.mubr.bf16.mxu0 %v5317_v28  ;;  %1318 = vmatpush1.bf16.msra.mxu0 %v5041_v55  ;;  %v5131_v55 = vld [vmem:[%s6762_s6 + $0x260] ss:$16 sps:$4 sm:$0xff]  }
 0x23f   :  { %1319 = vmatprep.subr.bf16.mxu0 %v5049_v16  ;;  %v5134_v16 = vld [vmem:[%s6762_s6 + $0x268] ss:$16 sps:$4 sm:$0xff]  }
 0x242   :  { %1320 = vmatpush1.bf16.msra.mxu0 %v5047_v56 }
 0x243   :  { %1321 = vmatprep.subr.bf16.mxu0 %v5055_v57  ;;  %v5139_v57 = vld [vmem:[%s6762_s6 + $0x284] ss:$16 sps:$4 sm:$0xff]  }
 0x245   :  { %4208 = vmatmul.mubr.msk.bf16.gmra.mrb[28].mxu0 %vm136_vm0, %v5531_v21  ;;  %v5073_v21 = vld [vmem:[%s6762_s6 + $0x124] ss:$16 sps:$4 sm:$0xff]  }
 0x246   :  { %1322 = vmatpush1.bf16.msra.mxu0 %v5053_v58  ;;  %v5142_v58 = vld [vmem:[%s6762_s6 + $0x28c] ss:$16 sps:$4 sm:$0xff]  }
 0x247   :  { %1323 = vmatprep.subr.bf16.mxu0 %v5061_v17 }
 0x24a   :  { %1324 = vmatpush1.bf16.msra.mxu0 %v5059_v61 }
 0x24b   :  { %1325 = vmatprep.subr.bf16.mxu0 %v5067_v62 }
 0x24e   :  { %1326 = vmatpush1.bf16.msra.mxu0 %v5065_v63 }
 0x24f   :  { %1327 = vmatprep.subr.bf16.mxu0 %v5073_v21  ;;  %v5137_v21 = vld [vmem:[%s6762_s6 + $0x280] ss:$16 sps:$4 sm:$0xff]  }
 0x252   :  { %1328 = vmatpush1.bf16.msra.mxu0 %v5071_v0  ;;  %v5140_v0 = vld [vmem:[%s6762_s6 + $0x288] ss:$16 sps:$4 sm:$0xff]  }
 0x253   :  { %1329 = vmatprep.subr.bf16.mxu0 %v5079_v1  ;;  %v5145_v1 = vld [vmem:[%s6762_s6 + $0x2a4] ss:$16 sps:$4 sm:$0xff]  }
 0x256   :  { %1330 = vmatpush1.bf16.msra.mxu0 %v5077_v2  ;;  %v5148_v2 = vld [vmem:[%s6762_s6 + $0x2ac] ss:$16 sps:$4 sm:$0xff]  }
 0x257   :  { %1331 = vmatprep.subr.bf16.mxu0 %v5085_v3 }
 0x25a   :  { %1332 = vmatpush1.bf16.msra.mxu0 %v5083_v4  ;;  %v5143_v4 = vld [vmem:[%s6762_s6 + $0x2a0] ss:$16 sps:$4 sm:$0xff]  }
 0x25b   :  { %1333 = vmatprep.subr.bf16.mxu0 %v5091_v5  ;;  %v5146_v5 = vld [vmem:[%s6762_s6 + $0x2a8] ss:$16 sps:$4 sm:$0xff]  }
 0x25e   :  { %1334 = vmatpush1.bf16.msra.mxu0 %v5089_v6 }
 0x25f   :  { %1335 = vmatprep.subr.bf16.mxu0 %v5097_v7  ;;  %v5151_v7 = vld [vmem:[%s6762_s6 + $0x2c4] ss:$16 sps:$4 sm:$0xff]  }
 0x262   :  { %1336 = vmatpush1.bf16.msra.mxu0 %v5095_v9  ;;  %v5154_v9 = vld [vmem:[%s6762_s6 + $0x2cc] ss:$16 sps:$4 sm:$0xff]  }
 0x263   :  { %1337 = vmatprep.subr.bf16.mxu0 %v5103_v12 }
 0x266   :  { %1338 = vmatpush1.bf16.msra.mxu0 %v5101_v13 }
 0x267   :  { %1339 = vmatprep.subr.bf16.mxu0 %v5109_v14 }
 0x26a   :  { %1340 = vmatpush1.bf16.msra.mxu0 %v5107_v18  ;;  %v5149_v18 = vld [vmem:[%s6762_s6 + $0x2c0] ss:$16 sps:$4 sm:$0xff]  }
 0x26b   :  { %1775 = vmatprep.subr.bf16.mxu0 %v5115_v20  ;;  %v5157_v20 = vld [vmem:[%s6762_s6 + $0x2e4] ss:$16 sps:$4 sm:$0xff]  }
 0x300   :  { %v878_v23 = vpop.f32.mrb[16].mxu0 }
 0x301   :  { %v880_v24 = vpop.f32.mrb[17].mxu0 }
 0x302   :  { %v882_v25 = vpop.f32.mrb[18].mxu0 }
 0x303   :  { %v917_v26 = vpack.c.bf16 %v882_v25, %v878_v23  ;;  %v884_v30 = vpop.f32.mrb[19].mxu0  ;;  %v5155_v23 = vld [vmem:[%s6762_s6 + $0x2e0] ss:$16 sps:$4 sm:$0xff]   ;;  %v5163_v25 = vld [vmem:[%s6762_s6 + $0x304] ss:$16 sps:$4 sm:$0xff]  }
 0x304   :  { %v918_v31 = vpack.c.bf16 %v884_v30, %v880_v24  ;;  %v5158_v24 = vld [vmem:[%s6762_s6 + $0x2e8] ss:$16 sps:$4 sm:$0xff]   ;;  %v5161_v30 = vld [vmem:[%s6762_s6 + $0x300] ss:$16 sps:$4 sm:$0xff]  }
 0x306   :  { %1341 = vmatprep.mubr.bf16.mxu0 %v918_v31  ;;  %1414 = vmatprep.mubr.bf16.mxu1 %v918_v31  ;;  %v5164_v31 = vld [vmem:[%s6762_s6 + $0x308] ss:$16 sps:$4 sm:$0xff]  }
 0x307   :  { %1342 = vmatmul.mubr.bf16.vlgmr.msra.gmra.mrb[32].mxu0 %v917_v26  ;;  %1415 = vmatmul.mubr.bf16.vlgmr.msra.gmra.mrb[16].mxu1 %v917_v26  ;;  %v5166_v26 = vld [vmem:[%s6762_s6 + $0x30c] ss:$16 sps:$4 sm:$0xff]  }
 0x308   :  { %1776 = vmatpush1.bf16.msra.mxu0 %v5113_v32  ;;  %1849 = vmatpush1.bf16.msra.mxu1 %v5116_v33  ;;  %v888_v36 = vpop.f32.mrb[20].mxu0  ;;  %v5169_v32 = vld [vmem:[%s6762_s6 + $0x324] ss:$16 sps:$4 sm:$0xff]   ;;  %v5172_v33 = vld [vmem:[%s6762_s6 + $0x32c] ss:$16 sps:$4 sm:$0xff]  }
 0x309   :  { %v890_v39 = vpop.f32.mrb[21].mxu0  ;;  %1777 = vmatprep.subr.bf16.mxu0 %v5121_v34  ;;  %1850 = vmatprep.subr.bf16.mxu1 %v5124_v35  ;;  %v5167_v34 = vld [vmem:[%s6762_s6 + $0x320] ss:$16 sps:$4 sm:$0xff]   ;;  %v5170_v35 = vld [vmem:[%s6762_s6 + $0x328] ss:$16 sps:$4 sm:$0xff]  }
 0x30a   :  { %v892_v49 = vpop.f32.mrb[22].mxu0 }
 0x30b   :  { %v919_v45 = vpack.c.bf16 %v892_v49, %v888_v36  ;;  %v894_v46 = vpop.f32.mrb[23].mxu0  ;;  %v5175_v36 = vld [vmem:[%s6762_s6 + $0x344] ss:$16 sps:$4 sm:$0xff]   ;;  %v5179_v49 = vld [vmem:[%s6762_s6 + $0x360] ss:$16 sps:$4 sm:$0xff]  }
 0x30c   :  { %v920_v50 = vpack.c.bf16 %v894_v46, %v890_v39  ;;  %1778 = vmatpush1.bf16.msra.mxu0 %v5119_v37  ;;  %1851 = vmatpush1.bf16.msra.mxu1 %v5122_v38  ;;  %v5178_v37 = vld [vmem:[%s6762_s6 + $0x34c] ss:$16 sps:$4 sm:$0xff]   ;;  %v5173_v38 = vld [vmem:[%s6762_s6 + $0x340] ss:$16 sps:$4 sm:$0xff]   ;;  %v5176_v39 = vld [vmem:[%s6762_s6 + $0x348] ss:$16 sps:$4 sm:$0xff]  }
 0x30d   :  { %1779 = vmatprep.subr.bf16.mxu0 %v5127_v41  ;;  %1852 = vmatprep.subr.bf16.mxu1 %v5130_v42  ;;  %v5181_v41 = vld [vmem:[%s6762_s6 + $0x364] ss:$16 sps:$4 sm:$0xff]   ;;  %v5184_v42 = vld [vmem:[%s6762_s6 + $0x36c] ss:$16 sps:$4 sm:$0xff]  }
 0x30e   :  { %1351 = vmatprep.mubr.bf16.mxu0 %v920_v50  ;;  %1424 = vmatprep.mubr.bf16.mxu1 %v920_v50  ;;  %v5187_v46 = vld [vmem:[%s6762_s6 + $0x384] ss:$16 sps:$4 sm:$0xff]   ;;  %v5190_v50 = vld [vmem:[%s6762_s6 + $0x38c] ss:$16 sps:$4 sm:$0xff]  }
 0x30f   :  { %1352 = vmatmul.mubr.bf16.gmra.mrb[36].mxu0 %v919_v45  ;;  %1425 = vmatmul.mubr.bf16.gmra.mrb[20].mxu1 %v919_v45  ;;  %v5182_v45 = vld [vmem:[%s6762_s6 + $0x368] ss:$16 sps:$4 sm:$0xff]  }
 0x310   :  { %1780 = vmatpush1.bf16.msra.mxu0 %v5125_v51  ;;  %1853 = vmatpush1.bf16.msra.mxu1 %v5128_v52  ;;  %v898_v54 = vpop.f32.mrb[24].mxu0  ;;  %v5185_v51 = vld [vmem:[%s6762_s6 + $0x380] ss:$16 sps:$4 sm:$0xff]   ;;  %v5188_v52 = vld [vmem:[%s6762_s6 + $0x388] ss:$16 sps:$4 sm:$0xff]  }
 0x311   :  { %v900_v56 = vpop.f32.mrb[25].mxu0  ;;  %1781 = vmatprep.subr.bf16.mxu0 %v5133_v8  ;;  %1854 = vmatprep.subr.bf16.mxu1 %v5136_v53  ;;  %v5193_v8 = vld [vmem:[%s6762_s6 + $0x3a4] ss:$16 sps:$4 sm:$0xff]   ;;  %v5196_v53 = vld [vmem:[%s6762_s6 + $0x3ac] ss:$16 sps:$4 sm:$0xff]  }
 0x312   :  { %v902_v17 = vpop.f32.mrb[26].mxu0 }
 0x313   :  { %v921_v61 = vpack.c.bf16 %v902_v17, %v898_v54  ;;  %v904_v62 = vpop.f32.mrb[27].mxu0  ;;  %v5191_v54 = vld [vmem:[%s6762_s6 + $0x3a0] ss:$16 sps:$4 sm:$0xff]   ;;  %v5205_v17 = vld [vmem:[%s6762_s6 + $0x3e4] ss:$16 sps:$4 sm:$0xff]  }
 0x314   :  { %v922_v63 = vpack.c.bf16 %v904_v62, %v900_v56  ;;  %1782 = vmatpush1.bf16.msra.mxu0 %v5131_v55  ;;  %1855 = vmatpush1.bf16.msra.mxu1 %v5134_v16  ;;  %v5194_v55 = vld [vmem:[%s6762_s6 + $0x3a8] ss:$16 sps:$4 sm:$0xff]   ;;  %v5199_v16 = vld [vmem:[%s6762_s6 + $0x3c4] ss:$16 sps:$4 sm:$0xff]   ;;  %v5202_v56 = vld [vmem:[%s6762_s6 + $0x3cc] ss:$16 sps:$4 sm:$0xff]  }
 0x315   :  { %1783 = vmatprep.subr.bf16.mxu0 %v5139_v57  ;;  %1856 = vmatprep.subr.bf16.mxu1 %v5142_v58  ;;  %v5197_v57 = vld [vmem:[%s6762_s6 + $0x3c0] ss:$16 sps:$4 sm:$0xff]   ;;  %v5200_v58 = vld [vmem:[%s6762_s6 + $0x3c8] ss:$16 sps:$4 sm:$0xff]  }
 0x316   :  { %1361 = vmatprep.mubr.bf16.mxu0 %v922_v63  ;;  %1434 = vmatprep.mubr.bf16.mxu1 %v922_v63  ;;  %v5203_v62 = vld [vmem:[%s6762_s6 + $0x3e0] ss:$16 sps:$4 sm:$0xff]   ;;  %v5206_v63 = vld [vmem:[%s6762_s6 + $0x3e8] ss:$16 sps:$4 sm:$0xff]  }
 0x317   :  { %1362 = vmatmul.mubr.bf16.gmra.mrb[40].mxu0 %v921_v61  ;;  %1435 = vmatmul.mubr.bf16.gmra.mrb[24].mxu1 %v921_v61  ;;  %v5208_v61 = vld [vmem:[%s6762_s6 + $0x3ec] ss:$16 sps:$4 sm:$0xff]  }
 0x318   :  { %1784 = vmatpush1.bf16.msra.mxu0 %v5137_v21  ;;  %1857 = vmatpush1.bf16.msra.mxu1 %v5140_v0  ;;  %v908_v3 = vpop.f32.mrb[28].mxu0  ;;  %v5214_v21 = vld [vmem:[%s6762_s6 + $0x40c] ss:$16 sps:$4 sm:$0xff]   ;;  %v5212_v0 = vld [vmem:[%s6762_s6 + $0x408] ss:$16 sps:$4 sm:$0xff]  }
 0x319   :  { %v910_v6 = vpop.f32.mrb[29].mxu0  ;;  %1785 = vmatprep.subr.bf16.mxu0 %v5145_v1  ;;  %1858 = vmatprep.subr.bf16.mxu1 %v5148_v2  ;;  %v5220_v1 = vld [vmem:[%s6762_s6 + $0x42c] ss:$16 sps:$4 sm:$0xff]  }
 0x31a   :  { %v912_v12 = vpop.f32.mrb[30].mxu0  ;;  %v5226_v2 = vld [vmem:[%s6762_s6 + $0x44c] ss:$16 sps:$4 sm:$0xff]  }
 0x31b   :  { %v923_v13 = vpack.c.bf16 %v912_v12, %v908_v3  ;;  %v914_v14 = vpop.f32.mrb[31].mxu0  ;;  %v5224_v3 = vld [vmem:[%s6762_s6 + $0x448] ss:$16 sps:$4 sm:$0xff]   ;;  %v5262_v12 = vld [vmem:[%s6762_s6 + $0x50c] ss:$16 sps:$4 sm:$0xff]  }
 0x31c   :  { %v924_v15 = vpack.c.bf16 %v914_v14, %v910_v6  ;;  %1786 = vmatpush1.bf16.msra.mxu0 %v5143_v4  ;;  %1859 = vmatpush1.bf16.msra.mxu1 %v5146_v5  ;;  %v5211_v4 = vld [vmem:[%s6762_s6 + $0x404] ss:$16 sps:$4 sm:$0xff]   ;;  %v5244_v5 = vld [vmem:[%s6762_s6 + $0x4ac] ss:$16 sps:$4 sm:$0xff]   ;;  %v5242_v6 = vld [vmem:[%s6762_s6 + $0x4a8] ss:$16 sps:$4 sm:$0xff]  }
 0x31d   :  { %1787 = vmatprep.subr.bf16.mxu0 %v5151_v7  ;;  %1860 = vmatprep.subr.bf16.mxu1 %v5154_v9  ;;  %v5250_v7 = vld [vmem:[%s6762_s6 + $0x4cc] ss:$16 sps:$4 sm:$0xff]   ;;  %v5248_v9 = vld [vmem:[%s6762_s6 + $0x4c8] ss:$16 sps:$4 sm:$0xff]  }
 0x31e   :  { %1371 = vmatprep.mubr.bf16.mxu0 %v924_v15  ;;  %1444 = vmatprep.mubr.bf16.mxu1 %v924_v15  ;;  %v5260_v14 = vld [vmem:[%s6762_s6 + $0x508] ss:$16 sps:$4 sm:$0xff]   ;;  %v5268_v15 = vld [vmem:[%s6762_s6 + $0x52c] ss:$16 sps:$4 sm:$0xff]  }
 0x31f   :  { %1372 = vmatmul.mubr.bf16.gmra.mrb[44].mxu0 %v923_v13  ;;  %1445 = vmatmul.mubr.bf16.gmra.mrb[28].mxu1 %v923_v13  ;;  %v5209_v13 = vld [vmem:[%s6762_s6 + $0x400] ss:$16 sps:$4 sm:$0xff]  }
 0x320   :  { %1788 = vmatpush1.bf16.msra.mxu0 %v5149_v18  ;;  %1861 = vmatpush1.bf16.msra.mxu1 %v5152_v19  ;;  %v5313_v18 = vld [vmem:[%s6761_s5] sm:$0xff]  }
 0x321   :  { %1807 = vmatprep.mubr.bf16.mxu0 %v5742_v60  ;;  %1880 = vmatprep.mubr.bf16.mxu1 %v5742_v60  ;;  %v5215_v19 = vld [vmem:[%s6762_s6 + $0x420] ss:$16 sps:$4 sm:$0xff]  }
 0x322   :  { %1789 = vmatprep.subr.bf16.mxu0 %v5157_v20  ;;  %1862 = vmatprep.subr.bf16.mxu1 %v5160_v22  ;;  %v5223_v20 = vld [vmem:[%s6762_s6 + $0x444] ss:$16 sps:$4 sm:$0xff]   ;;  %v5266_v22 = vld [vmem:[%s6762_s6 + $0x528] ss:$16 sps:$4 sm:$0xff]  }
 0x324   :  { %1790 = vmatpush1.bf16.msra.mxu0 %v5155_v23  ;;  %1863 = vmatpush1.bf16.msra.mxu1 %v5158_v24  ;;  %v5274_v23 = vld [vmem:[%s6762_s6 + $0x54c] ss:$16 sps:$4 sm:$0xff]   ;;  %v5221_v24 = vld [vmem:[%s6762_s6 + $0x440] ss:$16 sps:$4 sm:$0xff]  }
 0x325   :  { %1791 = vmatprep.subr.bf16.mxu0 %v5163_v25  ;;  %1864 = vmatprep.subr.bf16.mxu1 %v5166_v26  ;;  %v5229_v25 = vld [vmem:[%s6762_s6 + $0x464] ss:$16 sps:$4 sm:$0xff]   ;;  %v5272_v26 = vld [vmem:[%s6762_s6 + $0x548] ss:$16 sps:$4 sm:$0xff]  }
 0x328   :  { %1792 = vmatpush1.bf16.msra.mxu0 %v5161_v30  ;;  %1865 = vmatpush1.bf16.msra.mxu1 %v5164_v31  ;;  %v5280_v30 = vld [vmem:[%s6762_s6 + $0x56c] ss:$16 sps:$4 sm:$0xff]  }
 0x329   :  { %1793 = vmatprep.subr.bf16.mxu0 %v5169_v32  ;;  %1866 = vmatprep.subr.bf16.mxu1 %v5172_v33  ;;  %v5314_v31 = vld [vmem:[%s6761_s5 + $0x8] sm:$0xff]   ;;  %v5227_v32 = vld [vmem:[%s6762_s6 + $0x460] ss:$16 sps:$4 sm:$0xff]   ;;  %v5235_v33 = vld [vmem:[%s6762_s6 + $0x484] ss:$16 sps:$4 sm:$0xff]  }
 0x32c   :  { %1794 = vmatpush1.bf16.msra.mxu0 %v5167_v34  ;;  %1867 = vmatpush1.bf16.msra.mxu1 %v5170_v35  ;;  %v5278_v34 = vld [vmem:[%s6762_s6 + $0x568] ss:$16 sps:$4 sm:$0xff]   ;;  %v5286_v35 = vld [vmem:[%s6762_s6 + $0x58c] ss:$16 sps:$4 sm:$0xff]  }
 0x32d   :  { %1795 = vmatprep.subr.bf16.mxu0 %v5175_v36  ;;  %1868 = vmatprep.subr.bf16.mxu1 %v5178_v37  ;;  %v5233_v36 = vld [vmem:[%s6762_s6 + $0x480] ss:$16 sps:$4 sm:$0xff]   ;;  %v5241_v37 = vld [vmem:[%s6762_s6 + $0x4a4] ss:$16 sps:$4 sm:$0xff]  }
 0x330   :  { %1796 = vmatpush1.bf16.msra.mxu0 %v5173_v38  ;;  %1869 = vmatpush1.bf16.msra.mxu1 %v5176_v39  ;;  %v5284_v38 = vld [vmem:[%s6762_s6 + $0x588] ss:$16 sps:$4 sm:$0xff]   ;;  %v5292_v39 = vld [vmem:[%s6762_s6 + $0x5ac] ss:$16 sps:$4 sm:$0xff]  }
 0x331   :  { %1797 = vmatprep.subr.bf16.mxu0 %v5181_v41  ;;  %1870 = vmatprep.subr.bf16.mxu1 %v5184_v42  ;;  %v5315_v41 = vld [vmem:[%s6761_s5 + $0x10] sm:$0xff]  }
 0x332   :  { %v5239_v42 = vld [vmem:[%s6762_s6 + $0x4a0] ss:$16 sps:$4 sm:$0xff]  }
 0x334   :  { %1798 = vmatpush1.bf16.msra.mxu0 %v5179_v49  ;;  %1871 = vmatpush1.bf16.msra.mxu1 %v5182_v45  ;;  %v5247_v49 = vld [vmem:[%s6762_s6 + $0x4c4] ss:$16 sps:$4 sm:$0xff]   ;;  %v5290_v45 = vld [vmem:[%s6762_s6 + $0x5a8] ss:$16 sps:$4 sm:$0xff]  }
 0x335   :  { %1799 = vmatprep.subr.bf16.mxu0 %v5187_v46  ;;  %1872 = vmatprep.subr.bf16.mxu1 %v5190_v50  ;;  %v5245_v46 = vld [vmem:[%s6762_s6 + $0x4c0] ss:$16 sps:$4 sm:$0xff]   ;;  %v5253_v50 = vld [vmem:[%s6762_s6 + $0x4e4] ss:$16 sps:$4 sm:$0xff]  }
 0x338   :  { %1800 = vmatpush1.bf16.msra.mxu0 %v5185_v51  ;;  %1873 = vmatpush1.bf16.msra.mxu1 %v5188_v52  ;;  %v5296_v51 = vld [vmem:[%s6762_s6 + $0x5c8] ss:$16 sps:$4 sm:$0xff]  }
 0x339   :  { %1801 = vmatprep.subr.bf16.mxu0 %v5193_v8  ;;  %1874 = vmatprep.subr.bf16.mxu1 %v5196_v53  ;;  %v5316_v52 = vld [vmem:[%s6761_s5 + $0x18] sm:$0xff]   ;;  %v5251_v8 = vld [vmem:[%s6762_s6 + $0x4e0] ss:$16 sps:$4 sm:$0xff]   ;;  %v5259_v53 = vld [vmem:[%s6762_s6 + $0x504] ss:$16 sps:$4 sm:$0xff]  }
 0x33c   :  { %1802 = vmatpush1.bf16.msra.mxu0 %v5191_v54  ;;  %1875 = vmatpush1.bf16.msra.mxu1 %v5194_v55  ;;  %v5257_v54 = vld [vmem:[%s6762_s6 + $0x500] ss:$16 sps:$4 sm:$0xff]   ;;  %v5265_v55 = vld [vmem:[%s6762_s6 + $0x524] ss:$16 sps:$4 sm:$0xff]  }
 0x33d   :  { %1803 = vmatprep.subr.bf16.mxu0 %v5199_v16  ;;  %1876 = vmatprep.subr.bf16.mxu1 %v5202_v56  ;;  %v5263_v16 = vld [vmem:[%s6762_s6 + $0x520] ss:$16 sps:$4 sm:$0xff]   ;;  %v5271_v56 = vld [vmem:[%s6762_s6 + $0x544] ss:$16 sps:$4 sm:$0xff]  }
 0x340   :  { %1804 = vmatpush1.bf16.msra.mxu0 %v5197_v57  ;;  %1877 = vmatpush1.bf16.msra.mxu1 %v5200_v58  ;;  %v5269_v57 = vld [vmem:[%s6762_s6 + $0x540] ss:$16 sps:$4 sm:$0xff]   ;;  %v5277_v58 = vld [vmem:[%s6762_s6 + $0x564] ss:$16 sps:$4 sm:$0xff]  }
 0x341   :  { %1805 = vmatprep.subr.bf16.mxu0 %v5205_v17  ;;  %1878 = vmatprep.subr.bf16.mxu1 %v5208_v61  ;;  %v5275_v17 = vld [vmem:[%s6762_s6 + $0x560] ss:$16 sps:$4 sm:$0xff]   ;;  %v5283_v61 = vld [vmem:[%s6762_s6 + $0x584] ss:$16 sps:$4 sm:$0xff]  }
 0x344   :  { %1806 = vmatpush1.bf16.msra.mxu0 %v5203_v62  ;;  %1879 = vmatpush1.bf16.msra.mxu1 %v5206_v63  ;;  %v5281_v62 = vld [vmem:[%s6762_s6 + $0x580] ss:$16 sps:$4 sm:$0xff]   ;;  %v5289_v63 = vld [vmem:[%s6762_s6 + $0x5a4] ss:$16 sps:$4 sm:$0xff]  }
 0x345   :  { %1921 = vmatprep.subr.bf16.mxu0 %v5742_v60  ;;  %2460 = vmatprep.subr.bf16.mxu1 %v5214_v21  ;;  %v5218_v60 = vld [vmem:[%s6762_s6 + $0x428] ss:$16 sps:$4 sm:$0xff]   ;;  %v5287_v21 = vld [vmem:[%s6762_s6 + $0x5a0] ss:$16 sps:$4 sm:$0xff]  }
 0x347   :  { %1808 = vmatmul.mubr.bf16.vlgmr.msra.gmra.mrb[32].mxu0 %v5740_v59  ;;  %1881 = vmatmul.mubr.bf16.vlgmr.msra.gmra.mrb[16].mxu1 %v5740_v59 }
 0x348   :  { %1817 = vmatprep.mubr.bf16.mxu0 %v5748_v11  ;;  %1890 = vmatprep.mubr.bf16.mxu1 %v5748_v11 }
 0x349   :  { %1922 = vmatpush1.bf16.msra.mxu0 %v5740_v59  ;;  %2461 = vmatpush1.bf16.msra.mxu1 %v5212_v0  ;;  %v5232_v59 = vld [vmem:[%s6762_s6 + $0x46c] ss:$16 sps:$4 sm:$0xff]   ;;  %v5295_v0 = vld [vmem:[%s6762_s6 + $0x5c4] ss:$16 sps:$4 sm:$0xff]  }
 0x34a   :  { %1923 = vmatprep.subr.bf16.mxu0 %v5748_v11  ;;  %2462 = vmatprep.subr.bf16.mxu1 %v5220_v1  ;;  %v5230_v11 = vld [vmem:[%s6762_s6 + $0x468] ss:$16 sps:$4 sm:$0xff]   ;;  %v5293_v1 = vld [vmem:[%s6762_s6 + $0x5c0] ss:$16 sps:$4 sm:$0xff]  }
 0x34d   :  { %1924 = vmatpush1.bf16.msra.mxu0 %v5746_v10  ;;  %2463 = vmatpush1.bf16.msra.mxu1 %v5218_v60  ;;  %v5301_v60 = vld [vmem:[%s6762_s6 + $0x5e4] ss:$16 sps:$4 sm:$0xff]  }
 0x34e   :  { %1925 = vmatprep.subr.bf16.mxu0 %v5754_v29  ;;  %2464 = vmatprep.subr.bf16.mxu1 %v5226_v2  ;;  %v5304_v2 = vld [vmem:[%s6762_s6 + $0x5ec] ss:$16 sps:$4 sm:$0xff]  }
 0x34f   :  { %1818 = vmatmul.mubr.bf16.gmra.mrb[36].mxu0 %v5746_v10  ;;  %1891 = vmatmul.mubr.bf16.gmra.mrb[20].mxu1 %v5746_v10  ;;  %v5238_v10 = vld [vmem:[%s6762_s6 + $0x48c] ss:$16 sps:$4 sm:$0xff]  }
 0x350   :  { %1827 = vmatprep.mubr.bf16.mxu0 %v5754_v29  ;;  %1900 = vmatprep.mubr.bf16.mxu1 %v5754_v29  ;;  %v5236_v29 = vld [vmem:[%s6762_s6 + $0x488] ss:$16 sps:$4 sm:$0xff]  }
 0x351   :  { %1926 = vmatpush1.bf16.msra.mxu0 %v5752_v27  ;;  %2465 = vmatpush1.bf16.msra.mxu1 %v5224_v3  ;;  %v5299_v3 = vld [vmem:[%s6762_s6 + $0x5e0] ss:$16 sps:$4 sm:$0xff]  }
 0x352   :  { %1927 = vmatprep.subr.bf16.mxu0 %v5760_v48  ;;  %2466 = vmatprep.subr.bf16.mxu1 %v5232_v59  ;;  %v5302_v59 = vld [vmem:[%s6762_s6 + $0x5e8] ss:$16 sps:$4 sm:$0xff]  }
 0x355   :  { %1928 = vmatpush1.bf16.msra.mxu0 %v5758_v47  ;;  %2467 = vmatpush1.bf16.msra.mxu1 %v5230_v11 }
 0x356   :  { %2387 = vmatprep.subr.bf16.mxu0 %v5211_v4  ;;  %2468 = vmatprep.subr.bf16.mxu1 %v5238_v10 }
 0x357   :  { %1828 = vmatmul.mubr.bf16.gmra.mrb[40].mxu0 %v5752_v27  ;;  %1901 = vmatmul.mubr.bf16.gmra.mrb[24].mxu1 %v5752_v27  ;;  %v5256_v27 = vld [vmem:[%s6762_s6 + $0x4ec] ss:$16 sps:$4 sm:$0xff]  }
 0x358   :  { %1837 = vmatprep.mubr.bf16.mxu0 %v5760_v48  ;;  %1910 = vmatprep.mubr.bf16.mxu1 %v5760_v48  ;;  %v5254_v48 = vld [vmem:[%s6762_s6 + $0x4e8] ss:$16 sps:$4 sm:$0xff]  }
 0x359   :  { %2469 = vmatpush1.bf16.msra.mxu1 %v5236_v29 }
 0x35a   :  { %2470 = vmatprep.subr.bf16.mxu1 %v5244_v5 }
 0x35d   :  { %2471 = vmatpush1.bf16.msra.mxu1 %v5242_v6 }
 0x35e   :  { %2472 = vmatprep.subr.bf16.mxu1 %v5250_v7 }
 0x35f   :  { %1838 = vmatmul.mubr.bf16.gmra.mrb[44].mxu0 %v5758_v47  ;;  %1911 = vmatmul.mubr.bf16.gmra.mrb[28].mxu1 %v5758_v47  ;;  %v5217_v47 = vld [vmem:[%s6762_s6 + $0x424] ss:$16 sps:$4 sm:$0xff]  }
 0x360   :  { %1953 = vmatprep.mubr.bf16.mxu0 %v5317_v28 }
 0x361   :  { %2473 = vmatpush1.bf16.msra.mxu1 %v5248_v9 }
 0x362   :  { %2474 = vmatprep.subr.bf16.mxu1 %v5256_v27 }
 0x365   :  { %2475 = vmatpush1.bf16.msra.mxu1 %v5254_v48 }
 0x366   :  { %2476 = vmatprep.subr.bf16.mxu1 %v5262_v12 }
 0x367   :  { %4337 = vmatmul.mubr.msk.bf16.vlgmr.msra.gmra.mrb[48].mxu0 %vm136_vm0, %v5313_v18 }
 0x368   :  { %1963 = vmatprep.mubr.bf16.mxu0 %v5317_v28  ;;  %2388 = vmatpush1.bf16.msra.mxu0 %v5209_v13 }
 0x369   :  { %2389 = vmatprep.subr.bf16.mxu0 %v5217_v47  ;;  %2477 = vmatpush1.bf16.msra.mxu1 %v5260_v14 }
 0x36a   :  { %2478 = vmatprep.subr.bf16.mxu1 %v5268_v15 }
 0x36c   :  { %2390 = vmatpush1.bf16.msra.mxu0 %v5215_v19 }
 0x36d   :  { %2391 = vmatprep.subr.bf16.mxu0 %v5223_v20  ;;  %2479 = vmatpush1.bf16.msra.mxu1 %v5266_v22 }
 0x36e   :  { %2480 = vmatprep.subr.bf16.mxu1 %v5274_v23 }
 0x36f   :  { %4338 = vmatmul.mubr.msk.bf16.gmra.mrb[52].mxu0 %vm136_vm0, %v5314_v31  ;;  %v5318_v31 = vmov 0.0  }
 0x370   :  { %1973 = vmatprep.mubr.bf16.mxu0 %v5317_v28  ;;  %2392 = vmatpush1.bf16.msra.mxu0 %v5221_v24 }
 0x371   :  { %2393 = vmatprep.subr.bf16.mxu0 %v5229_v25  ;;  %2481 = vmatpush1.bf16.msra.mxu1 %v5272_v26 }
 0x372   :  { %2482 = vmatprep.subr.bf16.mxu1 %v5280_v30 }
 0x374   :  { %2394 = vmatpush1.bf16.msra.mxu0 %v5227_v32  ;;  %v2576_v32 = vsub.s32 2, %v5726_v40 }
 0x375   :  { %2395 = vmatprep.subr.bf16.mxu0 %v5235_v33  ;;  %2483 = vmatpush1.bf16.msra.mxu1 %v5278_v34  ;;  %v770_v33 = vld [vmem:[%s6764_s29] sm:$0xf]  ;;  %v2580_v34 = vsub.s32 3, %v5726_v40 }
 0x376   :  { %2484 = vmatprep.subr.bf16.mxu1 %v5286_v35  ;;  %v6314_v35 = vrot.slane %v770_v33, %v730_v43 }
 0x377   :  { %4339 = vmatmul.mubr.msk.bf16.gmra.mrb[56].mxu0 %vm136_vm0, %v5315_v41 }
 0x378   :  { %1983 = vmatprep.mubr.bf16.mxu0 %v5317_v28  ;;  %2396 = vmatpush1.bf16.msra.mxu0 %v5233_v36  ;;  %v5298_v28 = vld [vmem:[%s6762_s6 + $0x5cc] ss:$16 sps:$4 sm:$0xff]   ;;  %v6316_v36 = vrot.slane %v770_v33, %v2576_v32 }
 0x379   :  { %2397 = vmatprep.subr.bf16.mxu0 %v5241_v37  ;;  %2485 = vmatpush1.bf16.msra.mxu1 %v5284_v38  ;;  %v6320_v37 = vrot.slane %v770_v33, %v734_v44  ;;  %v6322_v38 = vrot.slane %v770_v33, %v2580_v34 }
 0x37a   :  { %2486 = vmatprep.subr.bf16.mxu1 %v5292_v39 }
 0x37c   :  { %2398 = vmatpush1.bf16.msra.mxu0 %v5239_v42 }
 0x37d   :  { %2399 = vmatprep.subr.bf16.mxu0 %v5247_v49  ;;  %2487 = vmatpush1.bf16.msra.mxu1 %v5290_v45 }
 0x37e   :  { %2488 = vmatprep.subr.bf16.mxu1 %v5298_v28 }
 0x37f   :  { %4340 = vmatmul.mubr.msk.bf16.gmra.mrb[60].mxu0 %vm136_vm0, %v5316_v52 }
 0x380   :  { %2400 = vmatpush1.bf16.msra.mxu0 %v5245_v46 }
 0x381   :  { %2401 = vmatprep.subr.bf16.mxu0 %v5253_v50  ;;  %2489 = vmatpush1.bf16.msra.mxu1 %v5296_v51 }
 0x382   :  { %2490 = vmatprep.subr.bf16.mxu1 %v5304_v2 }
 0x384   :  { %2402 = vmatpush1.bf16.msra.mxu0 %v5251_v8 }
 0x385   :  { %2403 = vmatprep.subr.bf16.mxu0 %v5259_v53  ;;  %2491 = vmatpush1.bf16.msra.mxu1 %v5302_v59 }
 0x388   :  { %2404 = vmatpush1.bf16.msra.mxu0 %v5257_v54 }
 0x389   :  { %2405 = vmatprep.subr.bf16.mxu0 %v5265_v55 }
 0x38c   :  { %2406 = vmatpush1.bf16.msra.mxu0 %v5263_v16 }
 0x38d   :  { %2407 = vmatprep.subr.bf16.mxu0 %v5271_v56 }
 0x390   :  { %2408 = vmatpush1.bf16.msra.mxu0 %v5269_v57 }
 0x391   :  { %2409 = vmatprep.subr.bf16.mxu0 %v5277_v58 }
 0x394   :  { %2410 = vmatpush1.bf16.msra.mxu0 %v5275_v17 }
 0x395   :  { %2411 = vmatprep.subr.bf16.mxu0 %v5283_v61 }
 0x398   :  { %2412 = vmatpush1.bf16.msra.mxu0 %v5281_v62 }
 0x399   :  { %2413 = vmatprep.subr.bf16.mxu0 %v5289_v63 }
 0x39c   :  { %2414 = vmatpush1.bf16.msra.mxu0 %v5287_v21 }
 0x39d   :  { %2415 = vmatprep.subr.bf16.mxu0 %v5295_v0 }
 0x3a0   :  { %2416 = vmatpush1.bf16.msra.mxu0 %v5293_v1 }
 0x3a1   :  { %2417 = vmatprep.subr.bf16.mxu0 %v5301_v60 }
 0x3a4   :  { %2418 = vmatpush1.bf16.msra.mxu0 %v5299_v3 }
 0x43a   :  { %v1955_v11 = vpop.f32.mrb[48].mxu0 }
 0x43b   :  { %v1957_v4 = vpop.f32.mrb[49].mxu0 }
 0x43c   :  { %v1959_v10 = vpop.f32.mrb[50].mxu0 }
 0x43d   :  { %v1994_v29 = vpack.c.bf16 %v1959_v10, %v1955_v11  ;;  %v1961_v5 = vpop.f32.mrb[51].mxu0 }
 0x43e   :  { %v1995_v6 = vpack.c.bf16 %v1961_v5, %v1957_v4 }
 0x440   :  { %2419 = vmatprep.mubr.bf16.mxu0 %v1995_v6  ;;  %2492 = vmatprep.mubr.bf16.mxu1 %v1995_v6 }
 0x441   :  { %2420 = vmatmul.mubr.bf16.vlgmr.msra.gmra.mrb[32].mxu0 %v1994_v29  ;;  %2493 = vmatmul.mubr.bf16.vlgmr.msra.gmra.mrb[16].mxu1 %v1994_v29 }
 0x442   :  { %v1965_v7 = vpop.f32.mrb[52].mxu0 }
 0x443   :  { %v1967_v9 = vpop.f32.mrb[53].mxu0 }
 0x444   :  { %v1969_v27 = vpop.f32.mrb[54].mxu0 }
 0x445   :  { %v1996_v48 = vpack.c.bf16 %v1969_v27, %v1965_v7  ;;  %v1971_v12 = vpop.f32.mrb[55].mxu0 }
 0x446   :  { %v1997_v13 = vpack.c.bf16 %v1971_v12, %v1967_v9 }
 0x448   :  { %2429 = vmatprep.mubr.bf16.mxu0 %v1997_v13  ;;  %2502 = vmatprep.mubr.bf16.mxu1 %v1997_v13 }
 0x449   :  { %2430 = vmatmul.mubr.bf16.gmra.mrb[36].mxu0 %v1996_v48  ;;  %2503 = vmatmul.mubr.bf16.gmra.mrb[20].mxu1 %v1996_v48 }
 0x44a   :  { %v1975_v47 = vpop.f32.mrb[56].mxu0 }
 0x44b   :  { %v1977_v14 = vpop.f32.mrb[57].mxu0 }
 0x44c   :  { %v1979_v15 = vpop.f32.mrb[58].mxu0 }
 0x44d   :  { %v1998_v18 = vpack.c.bf16 %v1979_v15, %v1975_v47  ;;  %v1981_v19 = vpop.f32.mrb[59].mxu0 }
 0x44e   :  { %v1999_v20 = vpack.c.bf16 %v1981_v19, %v1977_v14 }
 0x450   :  { %2439 = vmatprep.mubr.bf16.mxu0 %v1999_v20  ;;  %2512 = vmatprep.mubr.bf16.mxu1 %v1999_v20 }
 0x451   :  { %2440 = vmatmul.mubr.bf16.gmra.mrb[40].mxu0 %v1998_v18  ;;  %2513 = vmatmul.mubr.bf16.gmra.mrb[24].mxu1 %v1998_v18 }
 0x452   :  { %v1985_v22 = vpop.f32.mrb[60].mxu0 }
 0x453   :  { %v1987_v23 = vpop.f32.mrb[61].mxu0 }
 0x454   :  { %v1989_v24 = vpop.f32.mrb[62].mxu0 }
 0x455   :  { %v2000_v25 = vpack.c.bf16 %v1989_v24, %v1985_v22  ;;  %v1991_v26 = vpop.f32.mrb[63].mxu0 }
 0x456   :  { %v2001_v30 = vpack.c.bf16 %v1991_v26, %v1987_v23 }
 0x458   :  { %2449 = vmatprep.mubr.bf16.mxu0 %v2001_v30  ;;  %2522 = vmatprep.mubr.bf16.mxu1 %v2001_v30 }
 0x459   :  { %2450 = vmatmul.mubr.bf16.gmra.mrb[44].mxu0 %v2000_v25  ;;  %2523 = vmatmul.mubr.bf16.gmra.mrb[28].mxu1 %v2000_v25 }
 0x45a   :  { %2718 = vmatprep.mubr.f32.mxu0 %v5318_v31  ;;  %2789 = vmatprep.mubr.f32.mxu1 %v5318_v31 }
 0x514   :  { %v2421_v39 = vpop.f32.mrb[32].mxu0  ;;  %v2494_v41 = vpop.f32.mrb[16].mxu1 }
 0x515   :  { %v2586_v42 = vadd.f32 %v6314_v35, %v2421_v39  ;;  %v2588_v49 = vadd.f32 %v6316_v36, %v2494_v41  ;;  %v2423_v45 = vpop.f32.mrb[33].mxu0  ;;  %v2496_v28 = vpop.f32.mrb[17].mxu1 }
 0x516   :  { %v2587_v46 = vadd.f32 %v6320_v37, %v2423_v45  ;;  %v2589_v43 = vadd.f32 %v6322_v38, %v2496_v28  ;;  %v2425_v50 = vpop.f32.mrb[34].mxu0  ;;  %v2498_v51 = vpop.f32.mrb[18].mxu1 }
 0x517   :  { %v2590_v40 = vadd.f32 %v6314_v35, %v2425_v50  ;;  %v2592_v44 = vadd.f32 %v6316_v36, %v2498_v51  ;;  %v2427_v52 = vpop.f32.mrb[35].mxu0  ;;  %v2500_v8 = vpop.f32.mrb[19].mxu1  ;;  %v2618_v55 = vmax.f32 %v2586_v42, 0.0  ;;  %v2620_v16 = vmax.f32 %v2588_v49, 0.0 }
 0x518   :  { %v2591_v53 = vadd.f32 %v6320_v37, %v2427_v52  ;;  %v2593_v54 = vadd.f32 %v6322_v38, %v2500_v8  ;;  %v2619_v58 = vmax.f32 %v2587_v46, 0.0  ;;  %v2621_v17 = vmax.f32 %v2589_v43, 0.0 }
 0x519   :  { %v2622_v56 = vmax.f32 %v2590_v40, 0.0  ;;  %v2624_v57 = vmax.f32 %v2592_v44, 0.0 }
 0x51a   :  { %v2623_v61 = vmax.f32 %v2591_v53, 0.0  ;;  %v2625_v62 = vmax.f32 %v2593_v54, 0.0 }
 0x51b   :  { %v4752_v63 = vpack.c.bf16 %v2622_v56, %v2618_v55  ;;  %v4768_v21 = vpack.c.bf16 %v2624_v57, %v2620_v16 }
 0x51c   :  { %v4750_v0 = vpack.c.bf16 %v2623_v61, %v2619_v58  ;;  %v4766_v1 = vpack.c.bf16 %v2625_v62, %v2621_v17  ;;  %v2431_v60 = vpop.f32.mrb[36].mxu0  ;;  %v2504_v2 = vpop.f32.mrb[20].mxu1 }
 0x51d   :  { %v2594_v3 = vadd.f32 %v6314_v35, %v2431_v60  ;;  %v2596_v59 = vadd.f32 %v6316_v36, %v2504_v2  ;;  %v2433_v11 = vpop.f32.mrb[37].mxu0  ;;  %v2506_v4 = vpop.f32.mrb[21].mxu1 }
 0x51e   :  { %v2595_v10 = vadd.f32 %v6320_v37, %v2433_v11  ;;  %v2597_v29 = vadd.f32 %v6322_v38, %v2506_v4  ;;  %v2435_v5 = vpop.f32.mrb[38].mxu0  ;;  %v2508_v6 = vpop.f32.mrb[22].mxu1  ;;  %4751 = vmatprep.subr.bf16.mxu0 %v4750_v0  ;;  %4767 = vmatprep.subr.bf16.mxu1 %v4766_v1 }
 0x51f   :  { %v2598_v7 = vadd.f32 %v6314_v35, %v2435_v5  ;;  %v2600_v9 = vadd.f32 %v6316_v36, %v2508_v6  ;;  %v2437_v27 = vpop.f32.mrb[39].mxu0  ;;  %v2510_v48 = vpop.f32.mrb[23].mxu1  ;;  %4753 = vmatpush1.bf16.msra.mxu0 %v4752_v63  ;;  %4769 = vmatpush1.bf16.msra.mxu1 %v4768_v21  ;;  %v2626_v47 = vmax.f32 %v2594_v3, 0.0  ;;  %v2628_v14 = vmax.f32 %v2596_v59, 0.0 }
 0x520   :  { %v2599_v12 = vadd.f32 %v6320_v37, %v2437_v27  ;;  %v2601_v13 = vadd.f32 %v6322_v38, %v2510_v48  ;;  %v2627_v19 = vmax.f32 %v2595_v10, 0.0  ;;  %v2629_v20 = vmax.f32 %v2597_v29, 0.0  ;;  %v2812_v48 = vld [vmem:[%s6765_s3 + $0x80] sm:$0xff] }
 0x521   :  { %v2630_v15 = vmax.f32 %v2598_v7, 0.0  ;;  %v2632_v18 = vmax.f32 %v2600_v9, 0.0 }
 0x522   :  { %v2631_v22 = vmax.f32 %v2599_v12, 0.0  ;;  %v2633_v23 = vmax.f32 %v2601_v13, 0.0  ;;  %v2813_v12 = vld [vmem:[%s6765_s3 + $0x88] sm:$0xff] }
 0x523   :  { %v4756_v24 = vpack.c.bf16 %v2630_v15, %v2626_v47  ;;  %v4772_v25 = vpack.c.bf16 %v2632_v18, %v2628_v14  ;;  %v2844_v14 = vld [vmem:[%s6765_s3 + $0x180] sm:$0xff] }
 0x524   :  { %v4754_v26 = vpack.c.bf16 %v2631_v22, %v2627_v19  ;;  %v4770_v30 = vpack.c.bf16 %v2633_v23, %v2629_v20  ;;  %v2441_v32 = vpop.f32.mrb[40].mxu0  ;;  %v2514_v33 = vpop.f32.mrb[24].mxu1  ;;  %v2796_v23 = vld [vmem:[%s6765_s3] sm:$0xff] }
 0x525   :  { %v2602_v34 = vadd.f32 %v6314_v35, %v2441_v32  ;;  %v2604_v39 = vadd.f32 %v6316_v36, %v2514_v33  ;;  %v2443_v41 = vpop.f32.mrb[41].mxu0  ;;  %v2516_v42 = vpop.f32.mrb[25].mxu1  ;;  %v2828_v33 = vld [vmem:[%s6765_s3 + $0x100] sm:$0xff] }
 0x526   :  { %v2603_v49 = vadd.f32 %v6320_v37, %v2443_v41  ;;  %v2605_v45 = vadd.f32 %v6322_v38, %v2516_v42  ;;  %v2445_v28 = vpop.f32.mrb[42].mxu0  ;;  %v2518_v46 = vpop.f32.mrb[26].mxu1  ;;  %4755 = vmatprep.subr.bf16.mxu0 %v4754_v26  ;;  %4771 = vmatprep.subr.bf16.mxu1 %v4770_v30  ;;  %v4782_v30 = vpack.c.bf16 %v2813_v12, %v2812_v48  ;;  %v2815_v41 = vld [vmem:[%s6765_s3 + $0x98] sm:$0xff]  ;;  %v2846_v42 = vld [vmem:[%s6765_s3 + $0x190] sm:$0xff] }
 0x527   :  { %v2606_v43 = vadd.f32 %v6314_v35, %v2445_v28  ;;  %v2608_v50 = vadd.f32 %v6316_v36, %v2518_v46  ;;  %v2447_v51 = vpop.f32.mrb[43].mxu0  ;;  %v2520_v40 = vpop.f32.mrb[27].mxu1  ;;  %4757 = vmatpush1.bf16.msra.mxu0 %v4756_v24  ;;  %4773 = vmatpush1.bf16.msra.mxu1 %v4772_v25  ;;  %v2634_v8 = vmax.f32 %v2602_v34, 0.0  ;;  %v2636_v53 = vmax.f32 %v2604_v39, 0.0  ;;  %v2797_v24 = vld [vmem:[%s6765_s3 + $0x8] sm:$0xff]  ;;  %v2814_v39 = vld [vmem:[%s6765_s3 + $0x90] sm:$0xff] }
 0x528   :  { %v2607_v44 = vadd.f32 %v6320_v37, %v2447_v51  ;;  %v2609_v52 = vadd.f32 %v6322_v38, %v2520_v40  ;;  %v2635_v16 = vmax.f32 %v2603_v49, 0.0  ;;  %v2637_v56 = vmax.f32 %v2605_v45, 0.0  ;;  %v2829_v34 = vld [vmem:[%s6765_s3 + $0x108] sm:$0xff]  ;;  %v2847_v49 = vld [vmem:[%s6765_s3 + $0x198] sm:$0xff]  ;;  %v2650_v45 = vld [vmem:[%s6766_s2] sm:$0xf] }
 0x529   :  { %v2638_v54 = vmax.f32 %v2606_v43, 0.0  ;;  %v2640_v55 = vmax.f32 %v2608_v50, 0.0  ;;  %v4784_v28 = vpack.c.bf16 %v2797_v24, %v2796_v23  ;;  %v4816_v46 = vpack.c.bf16 %v2829_v34, %v2828_v33  ;;  %v2798_v43 = vld [vmem:[%s6765_s3 + $0x10] sm:$0xff]  ;;  %v2799_v50 = vld [vmem:[%s6765_s3 + $0x18] sm:$0xff]  ;;  %v2824_v33 = vld [vmem:[%s6765_s3 + $0xe0] sm:$0xff] }
 0x52a   :  { %v2639_v57 = vmax.f32 %v2607_v44, 0.0  ;;  %v2641_v58 = vmax.f32 %v2609_v52, 0.0  ;;  %v4786_v51 = vpack.c.bf16 %v2815_v41, %v2814_v39  ;;  %v4818_v40 = vpack.c.bf16 %v2847_v49, %v2846_v42  ;;  %v2830_v44 = vld [vmem:[%s6765_s3 + $0x110] sm:$0xff]  ;;  %v2831_v52 = vld [vmem:[%s6765_s3 + $0x118] sm:$0xff]  ;;  %v2825_v34 = vld [vmem:[%s6765_s3 + $0xe8] sm:$0xff] }
 0x52b   :  { %v4760_v17 = vpack.c.bf16 %v2638_v54, %v2634_v8  ;;  %v4776_v61 = vpack.c.bf16 %v2640_v55, %v2636_v53  ;;  %v2816_v8 = vld [vmem:[%s6765_s3 + $0xa0] sm:$0xff]  ;;  %v2817_v53 = vld [vmem:[%s6765_s3 + $0xa8] sm:$0xff]  ;;  %v2806_v23 = vld [vmem:[%s6765_s3 + $0x50] sm:$0xff] }
 0x52c   :  { %v4758_v62 = vpack.c.bf16 %v2639_v57, %v2635_v16  ;;  %v4774_v63 = vpack.c.bf16 %v2641_v58, %v2637_v56  ;;  %v2451_v21 = vpop.f32.mrb[44].mxu0  ;;  %v2524_v0 = vpop.f32.mrb[28].mxu1  ;;  %v2848_v54 = vld [vmem:[%s6765_s3 + $0x1a0] sm:$0xff]  ;;  %v2849_v55 = vld [vmem:[%s6765_s3 + $0x1a8] sm:$0xff]  ;;  %v4788_v16 = vpack.c.bf16 %v2799_v50, %v2798_v43  ;;  %v4820_v56 = vpack.c.bf16 %v2831_v52, %v2830_v44  ;;  %v2807_v24 = vld [vmem:[%s6765_s3 + $0x58] sm:$0xff] }
 0x52d   :  { %v2610_v1 = vadd.f32 %v6314_v35, %v2451_v21  ;;  %v2612_v60 = vadd.f32 %v6316_v36, %v2524_v0  ;;  %v2453_v2 = vpop.f32.mrb[45].mxu0  ;;  %v2526_v3 = vpop.f32.mrb[29].mxu1  ;;  %v2800_v57 = vld [vmem:[%s6765_s3 + $0x20] sm:$0xff]  ;;  %v2801_v58 = vld [vmem:[%s6765_s3 + $0x28] sm:$0xff]  ;;  %v2818_v21 = vld [vmem:[%s6765_s3 + $0xb0] sm:$0xff]  ;;  %v4804_v42 = vpack.c.bf16 %v2807_v24, %v2806_v23 }
 0x52e   :  { %v2611_v59 = vadd.f32 %v6320_v37, %v2453_v2  ;;  %v2613_v11 = vadd.f32 %v6322_v38, %v2526_v3  ;;  %v2455_v4 = vpop.f32.mrb[46].mxu0  ;;  %v2528_v10 = vpop.f32.mrb[30].mxu1  ;;  %4759 = vmatprep.subr.bf16.mxu0 %v4758_v62  ;;  %4775 = vmatprep.subr.bf16.mxu1 %v4774_v63  ;;  %v2832_v62 = vld [vmem:[%s6765_s3 + $0x120] sm:$0xff]  ;;  %v2833_v63 = vld [vmem:[%s6765_s3 + $0x128] sm:$0xff]  ;;  %v2819_v0 = vld [vmem:[%s6765_s3 + $0xb8] sm:$0xff]  ;;  %v4792_v2 = vpack.c.bf16 %v2801_v58, %v2800_v57 }
 0x52f   :  { %v2614_v29 = vadd.f32 %v6314_v35, %v2455_v4  ;;  %v2616_v5 = vadd.f32 %v6316_v36, %v2528_v10  ;;  %v2457_v6 = vpop.f32.mrb[47].mxu0  ;;  %v2530_v7 = vpop.f32.mrb[31].mxu1  ;;  %4761 = vmatpush1.bf16.msra.mxu0 %v4760_v17  ;;  %4777 = vmatpush1.bf16.msra.mxu1 %v4776_v61  ;;  %v2642_v13 = vmax.f32 %v2610_v1, 0.0  ;;  %v2644_v35 = vmax.f32 %v2612_v60, 0.0  ;;  %v2850_v1 = vld [vmem:[%s6765_s3 + $0x1b0] sm:$0xff]  ;;  %v2851_v60 = vld [vmem:[%s6765_s3 + $0x1b8] sm:$0xff] }
 0x530   :  { %v2615_v9 = vadd.f32 %v6320_v37, %v2457_v6  ;;  %v2617_v27 = vadd.f32 %v6322_v38, %v2530_v7  ;;  %v2845_v37 = vld [vmem:[%s6765_s3 + $0x188] sm:$0xff]  ;;  %v2643_v38 = vmax.f32 %v2611_v59, 0.0  ;;  %v2645_v15 = vmax.f32 %v2613_v11, 0.0  ;;  %v2802_v59 = vld [vmem:[%s6765_s3 + $0x30] sm:$0xff]  ;;  %v2803_v11 = vld [vmem:[%s6765_s3 + $0x38] sm:$0xff] }
 0x531   :  { %v2646_v47 = vmax.f32 %v2614_v29, 0.0  ;;  %v2648_v36 = vmax.f32 %v2616_v5, 0.0  ;;  %v4814_v32 = vpack.c.bf16 %v2845_v37, %v2844_v14  ;;  %v4790_v17 = vpack.c.bf16 %v2817_v53, %v2816_v8  ;;  %v2834_v29 = vld [vmem:[%s6765_s3 + $0x130] sm:$0xff]  ;;  %v2835_v5 = vld [vmem:[%s6765_s3 + $0x138] sm:$0xff]  ;;  %v2820_v6 = vld [vmem:[%s6765_s3 + $0xc0] sm:$0xff] }
 0x532   :  { %v2647_v18 = vmax.f32 %v2615_v9, 0.0  ;;  %v2649_v19 = vmax.f32 %v2617_v27, 0.0  ;;  %v4822_v61 = vpack.c.bf16 %v2849_v55, %v2848_v54  ;;  %v4824_v3 = vpack.c.bf16 %v2833_v63, %v2832_v62  ;;  %v2821_v7 = vld [vmem:[%s6765_s3 + $0xc8] sm:$0xff]  ;;  %v2852_v9 = vld [vmem:[%s6765_s3 + $0x1c0] sm:$0xff]  ;;  %v2827_v44 = vld [vmem:[%s6765_s3 + $0xf8] sm:$0xff] }
 0x533   :  { %v4764_v20 = vpack.c.bf16 %v2646_v47, %v2642_v13  ;;  %v4780_v22 = vpack.c.bf16 %v2648_v36, %v2644_v35  ;;  %v4794_v4 = vpack.c.bf16 %v2819_v0, %v2818_v21  ;;  %v4826_v10 = vpack.c.bf16 %v2851_v60, %v2850_v1  ;;  %v2853_v27 = vld [vmem:[%s6765_s3 + $0x1c8] sm:$0xff]  ;;  %v2804_v13 = vld [vmem:[%s6765_s3 + $0x40] sm:$0xff]  ;;  %v2858_v52 = vld [vmem:[%s6765_s3 + $0x1f0] sm:$0xff] }
 0x534   :  { %v4762_v25 = vpack.c.bf16 %v2647_v18, %v2643_v38  ;;  %v4778_v26 = vpack.c.bf16 %v2649_v19, %v2645_v15  ;;  %v4796_v48 = vpack.c.bf16 %v2803_v11, %v2802_v59  ;;  %v4828_v12 = vpack.c.bf16 %v2835_v5, %v2834_v29  ;;  %v2805_v35 = vld [vmem:[%s6765_s3 + $0x48] sm:$0xff]  ;;  %v2836_v14 = vld [vmem:[%s6765_s3 + $0x140] sm:$0xff]  ;;  %v2822_v38 = vld [vmem:[%s6765_s3 + $0xd0] sm:$0xff] }
 0x535   :  { %v4798_v47 = vpack.c.bf16 %v2821_v7, %v2820_v6  ;;  %v4830_v36 = vpack.c.bf16 %v2853_v27, %v2852_v9  ;;  %v2837_v37 = vld [vmem:[%s6765_s3 + $0x148] sm:$0xff]  ;;  %v2823_v15 = vld [vmem:[%s6765_s3 + $0xd8] sm:$0xff]  ;;  %v2854_v18 = vld [vmem:[%s6765_s3 + $0x1d0] sm:$0xff]  ;;  %v5319_v63 = vmov 0.0|0.0  }
 0x536   :  { %4763 = vmatprep.subr.bf16.mxu0 %v4762_v25  ;;  %4779 = vmatprep.subr.bf16.mxu1 %v4778_v26  ;;  %v2855_v19 = vld [vmem:[%s6765_s3 + $0x1d8] sm:$0xff]  ;;  %v4802_v25 = vpack.c.bf16 %v2823_v15, %v2822_v38  ;;  %v2856_v39 = vld [vmem:[%s6765_s3 + $0x1e0] sm:$0xff]  ;;  %v2857_v41 = vld [vmem:[%s6765_s3 + $0x1e8] sm:$0xff] }
 0x537   :  { %4765 = vmatpush1.bf16.msra.mxu0 %v4764_v20  ;;  %4781 = vmatpush1.bf16.msra.mxu1 %v4780_v22  ;;  %v4800_v20 = vpack.c.bf16 %v2805_v35, %v2804_v13  ;;  %v4832_v22 = vpack.c.bf16 %v2837_v37, %v2836_v14  ;;  %v4834_v26 = vpack.c.bf16 %v2855_v19, %v2854_v18  ;;  %v2840_v50 = vld [vmem:[%s6765_s3 + $0x160] sm:$0xff]  ;;  %v2859_v8 = vld [vmem:[%s6765_s3 + $0x1f8] sm:$0xff]  ;;  %v2842_v58 = vld [vmem:[%s6765_s3 + $0x170] sm:$0xff] }
 0x538   :  { %4783 = vmatprep.subr.bf16.mxu0 %v4782_v30  ;;  %4815 = vmatprep.subr.bf16.mxu1 %v4814_v32  ;;  %v2838_v30 = vld [vmem:[%s6765_s3 + $0x150] sm:$0xff]  ;;  %v2839_v32 = vld [vmem:[%s6765_s3 + $0x158] sm:$0xff]  ;;  %v4838_v43 = vpack.c.bf16 %v2857_v41, %v2856_v39  ;;  %v3001_v21 = vld [vmem:[%s6727_s10] sm:$0xff] }
 0x539   :  { %v4836_v49 = vpack.c.bf16 %v2839_v32, %v2838_v30  ;;  %v2811_v57 = vld [vmem:[%s6765_s3 + $0x78] sm:$0xff]  ;;  %v3002_v0 = vld [vmem:[%s6727_s10 + $0x8] sm:$0xff]  ;;  %v3003_v11 = vld [vmem:[%s6727_s10 + $0x10] sm:$0xff] }
 0x53a   :  { %4469 = vmatmul.mubr.msk.f32.vlgmr.msra.gmra.mrb[64].mxu0 %vm136_vm0, %v2650_v45  ;;  %4470 = vmatmul.mubr.msk.f32.vlgmr.msra.gmra.mrb[32].mxu1 %vm136_vm0, %v2650_v45  ;;  %v2808_v45 = vld [vmem:[%s6765_s3 + $0x60] sm:$0xff]  ;;  %v3252_v15 = vld [vmem:[%s6729_s13 + $0x8] sm:$0xff]  ;;  %v3253_v19 = vld [vmem:[%s6729_s13 + $0x10] sm:$0xff] }
 0x53b   :  { %4785 = vmatpush3.bf16.msra.mxu0 %v4784_v28  ;;  %4817 = vmatpush3.bf16.msra.mxu1 %v4816_v46  ;;  %v2809_v28 = vld [vmem:[%s6765_s3 + $0x68] sm:$0xff]  ;;  %v4806_v46 = vpack.c.bf16 %v2825_v34, %v2824_v33  ;;  %v3251_v38 = vld [vmem:[%s6729_s13] sm:$0xff] }
 0x53c   :  { %4787 = vmatprep.subr.bf16.mxu0 %v4786_v51  ;;  %4819 = vmatprep.subr.bf16.mxu1 %v4818_v40  ;;  %v2841_v51 = vld [vmem:[%s6765_s3 + $0x168] sm:$0xff]  ;;  %v2826_v40 = vld [vmem:[%s6765_s3 + $0xf0] sm:$0xff]  ;;  %v4808_v53 = vpack.c.bf16 %v2809_v28, %v2808_v45  ;;  %v4853_v18 = vpack.c.bf16 %v3252_v15, %v3251_v38  ;;  %v4476_v30 = vld [vmem:[%s6730_s11] ss:$0 sm:$0xff] }
 0x53d   :  { %v4840_v54 = vpack.c.bf16 %v2841_v51, %v2840_v50  ;;  %v4810_v55 = vpack.c.bf16 %v2827_v44, %v2826_v40  ;;  %v4477_v33 = vld [vmem:[%s6731_s12] ss:$0 sm:$0xff]  ;;  %v3496_v51 = vld [vmem:[%s6732_s16 + $0x8] sm:$0xff]  ;;  %v3497_v44 = vld [vmem:[%s6732_s16 + $0x10] sm:$0xff] }
 0x53e   :  { %v3495_v50 = vld [vmem:[%s6732_s16] sm:$0xff] }
 0x53f   :  { %4789 = vmatpush3.bf16.msra.mxu0 %v4788_v16  ;;  %4821 = vmatpush3.bf16.msra.mxu1 %v4820_v56  ;;  %v4842_v16 = vpack.c.bf16 %v2859_v8, %v2858_v52  ;;  %v2810_v56 = vld [vmem:[%s6765_s3 + $0x70] sm:$0xff]  ;;  %v4859_v40 = vpack.c.bf16 %v3496_v51, %v3495_v50  ;;  %v3498_v52 = vld [vmem:[%s6732_s16 + $0x18] sm:$0xff] }
 0x540   :  { %4791 = vmatprep.subr.bf16.mxu0 %v4790_v17  ;;  %4823 = vmatprep.subr.bf16.mxu1 %v4822_v61  ;;  %v4812_v17 = vpack.c.bf16 %v2811_v57, %v2810_v56  ;;  %v2843_v61 = vld [vmem:[%s6765_s3 + $0x178] sm:$0xff]  ;;  %v4862_v8 = vpack.c.bf16 %v3498_v52, %v3497_v44  ;;  %v4483_v56 = vld [vmem:[%s6733_s14] ss:$0 sm:$0xff] }
 0x541   :  { %v4844_v62 = vpack.c.bf16 %v2843_v61, %v2842_v58  ;;  %v4484_v58 = vld [vmem:[%s6734_s15] ss:$0 sm:$0xff] }
 0x543   :  { %4793 = vmatpush3.bf16.msra.mxu0 %v4792_v2  ;;  %4825 = vmatpush3.bf16.msra.mxu1 %v4824_v3  ;;  %v4847_v2 = vpack.c.bf16 %v3002_v0, %v3001_v21 }
 0x544   :  { %4795 = vmatprep.subr.bf16.mxu0 %v4794_v4  ;;  %4827 = vmatprep.subr.bf16.mxu1 %v4826_v10  ;;  %v3004_v4 = vld [vmem:[%s6727_s10 + $0x18] sm:$0xff] }
 0x545   :  { %v4850_v10 = vpack.c.bf16 %v3004_v4, %v3003_v11  ;;  %v3739_v11 = vld [vmem:[%s6735_s19 + $0x8] sm:$0xff] }
 0x547   :  { %4797 = vmatpush3.bf16.msra.mxu0 %v4796_v48  ;;  %4829 = vmatpush3.bf16.msra.mxu1 %v4828_v12  ;;  %v6579_v12 = vld [vmem:[%s6728_s9] sm:$0xf] }
 0x548   :  { %4799 = vmatprep.subr.bf16.mxu0 %v4798_v47  ;;  %4831 = vmatprep.subr.bf16.mxu1 %v4830_v36 }
 0x54b   :  { %4801 = vmatpush3.bf16.msra.mxu0 %v4800_v20  ;;  %4833 = vmatpush3.bf16.msra.mxu1 %v4832_v22  ;;  %v3254_v20 = vld [vmem:[%s6729_s13 + $0x18] sm:$0xff] }
 0x54c   :  { %4803 = vmatprep.subr.bf16.mxu0 %v4802_v25  ;;  %4835 = vmatprep.subr.bf16.mxu1 %v4834_v26  ;;  %v4856_v22 = vpack.c.bf16 %v3254_v20, %v3253_v19  ;;  %v3982_v19 = vld [vmem:[%s6739_s22] sm:$0xff]  ;;  %v3983_v20 = vld [vmem:[%s6739_s22 + $0x8] sm:$0xff] }
 0x54f   :  { %4805 = vmatpush3.bf16.msra.mxu0 %v4804_v42  ;;  %4837 = vmatpush3.bf16.msra.mxu1 %v4836_v49 }
 0x550   :  { %4807 = vmatprep.subr.bf16.mxu0 %v4806_v46  ;;  %4839 = vmatprep.subr.bf16.mxu1 %v4838_v43 }
 0x553   :  { %4809 = vmatpush3.bf16.msra.mxu0 %v4808_v53  ;;  %4841 = vmatpush3.bf16.msra.mxu1 %v4840_v54 }
 0x554   :  { %4811 = vmatprep.subr.bf16.mxu0 %v4810_v55  ;;  %4843 = vmatprep.subr.bf16.mxu1 %v4842_v16 }
 0x557   :  { %4813 = vmatpush3.bf16.msra.mxu0 %v4812_v17  ;;  %4845 = vmatpush3.bf16.msra.mxu1 %v4844_v62 }
 0x558   :  { %4670 = vmatprep.subr.mxu1 %v5318_v31  ;;  %4846 = vmatprep.subr.bf16.mxu0 %v5319_v63 }
 0x60d   :  { %v2720_v1 = vpop.f32.mrb[64].mxu0  ;;  %v2791_v60 = vpop.f32.mrb[32].mxu1 }
 0x60e   :  { %v2722_v3 = vpop.f32.mrb[65].mxu0  ;;  %v2793_v59 = vpop.f32.mrb[33].mxu1 }
 0x60f   :  { %2924 = vmatprep.mubr.f32.mxu0 %v2722_v3  ;;  %2994 = vmatprep.mubr.f32.mxu1 %v2793_v59  ;;  %v3738_v59 = vld [vmem:[%s6735_s19] sm:$0xff] }
 0x610   :  { %2925 = vmatmul.mubr.f32.vlgmr.msra.gmra.mrb[66].mxu0 %v2720_v1  ;;  %2995 = vmatmul.mubr.f32.vlgmr.msra.gmra.mrb[34].mxu1 %v2791_v60  ;;  %v4865_v4 = vpack.c.bf16 %v3739_v11, %v3738_v59 }
 0x611   :  { %4848 = vmatpush3.bf16.msra.mxu0 %v4847_v2  ;;  %4667 = vmatprep.mubr.msk.f32.mxu0 %vm5320_vm1, %v5318_v31 }
 0x612   :  { %4849 = vmatprep.subr.bf16.mxu0 %v5319_v63  ;;  %4672 = vmatprep.mubr.msk.f32.mxu1 %vm5320_vm1, %v5318_v31 }
 0x615   :  { %4851 = vmatpush3.bf16.msra.mxu0 %v4850_v10  ;;  %v3740_v10 = vld [vmem:[%s6735_s19 + $0x10] sm:$0xff] }
 0x616   :  { %4852 = vmatprep.subr.bf16.mxu0 %v5319_v63 }
 0x6e3   :  { %v4550_v29 = vpop.f32.mrb[66].mxu0  ;;  %v4585_v5 = vpop.f32.mrb[34].mxu1 }
 0x6e4   :  { %v4551_v6 = vpop.f32.mrb[67].mxu0  ;;  %v4586_v7 = vpop.f32.mrb[35].mxu1 }
 0x6e5   :  { %v4552_v9 = vadd.f32 %v4551_v6, %v4550_v29  ;;  %v4587_v27 = vadd.f32 %v4586_v7, %v4585_v5  ;;  %v3741_v29 = vld [vmem:[%s6735_s19 + $0x18] sm:$0xff] }
 0x6e6   :  { %v4868_v5 = vpack.c.bf16 %v3741_v29, %v3740_v10 }
 0x6e7   :  { %v2997_v48 = vadd.f32 %v4587_v27, %v4552_v9 }
 0x6e9   :  { %4668 = vmatmul.mubr.msk.f32.vlgmr.msra.gmra.mrb[68].mxu0 %vm3005_vm2, %v2997_v48  ;;  %v4490_v48 = vld [vmem:[%s6736_s17] ss:$0 sm:$0xff] }
 0x6ea   :  { %4688 = vmatprep.mubr.msk.f32.mxu0 %vm5320_vm1, %v5318_v31  ;;  %4854 = vmatpush3.bf16.msra.mxu0 %v4853_v18 }
 0x6eb   :  { %4855 = vmatprep.subr.bf16.mxu0 %v5319_v63 }
 0x6ee   :  { %4857 = vmatpush3.bf16.msra.mxu0 %v4856_v22  ;;  %v4871_v22 = vpack.c.bf16 %v3983_v20, %v3982_v19 }
 0x6ef   :  { %4858 = vmatprep.subr.bf16.mxu0 %v5319_v63 }
 0x7bc   :  { %v3075_v13 = vpop.f32.mrb[68].mxu0 }
 0x7bd   :  { %v4669_v35 = vpop.f32.mrb[69].mxu0  ;;  %4671 = vmatpush3.msk.msra.mxu1 %vm3085_vm3, %v3075_v13 }
 0x7be   :  { %4673 = vmatmul.mubr.msk.f32.vlgmr.msra.gmra.mrb[36].mxu1 %vm3081_vm4, %v6579_v12  ;;  %4675 = vmatprep.subr.mxu1 %v5318_v31  ;;  %v4491_v35 = vld [vmem:[%s6737_s18] ss:$0 sm:$0xff] }
 0x7bf   :  { %4677 = vmatprep.mubr.msk.f32.mxu1 %vm5320_vm1, %v5318_v31 }
 0x891   :  { %v3155_v47 = vpop.f32.mrb[36].mxu1 }
 0x892   :  { %v3159_v36 = vsub.f32 %v3075_v13, %v3155_v47  ;;  %v4674_v14 = vpop.f32.mrb[37].mxu1 }
 0x894   :  { %v3160_v37 = vmul.f32 %v3159_v36, %v3159_v36 }
 0x896   :  { %4676 = vmatpush3.msk.msra.mxu1 %vm3085_vm3, %v3160_v37 }
 0x897   :  { %4678 = vmatmul.mubr.msk.f32.vlgmr.msra.gmra.mrb[38].mxu1 %vm3081_vm4, %v6579_v12  ;;  %4691 = vmatprep.subr.mxu1 %v5318_v31 }
 0x898   :  { %4693 = vmatprep.mubr.msk.f32.mxu1 %vm5320_vm1, %v5318_v31 }
 0x96a   :  { %v3230_v23 = vpop.f32.mrb[38].mxu1 }
 0x96b   :  { %v3231_v24 = vadd.f32 1e-05, %v3230_v23  ;;  %v4679_v25 = vpop.f32.mrb[39].mxu1 }
 0x96d   :  { %5305 = vrsqrt.f32 %v3231_v24 }
 0x977   :  { %v5306_v26 = vpop.eup %5305 }
 0x978   :  { %v3235_v32 = vmul.f32 %v5306_v26, %v3159_v36  ;;  %v4497_v26 = vld [vmem:[%s6740_s20] ss:$0 sm:$0xff] }
 0x97a   :  { %v3242_v34 = vmul.f32 %v4476_v30, %v3235_v32  ;;  %v4498_v30 = vld [vmem:[%s6741_s21] ss:$0 sm:$0xff] }
 0x97c   :  { %v3249_v39 = vadd.f32 %v4477_v33, %v3242_v34 }
 0x97e   :  { %v3250_v41 = vmax.f32 %v3249_v39, 0.0  ;;  %v4499_v39 = vld [vmem:[%s6742_s23] ss:$0 sm:$0xff] }
 0x980   :  { %4689 = vmatmul.mubr.msk.f32.vlgmr.msra.gmra.mrb[70].mxu0 %vm3005_vm2, %v3250_v41 }
 0x981   :  { %4709 = vmatprep.mubr.msk.f32.mxu0 %vm5320_vm1, %v5318_v31  ;;  %4860 = vmatpush3.bf16.msra.mxu0 %v4859_v40 }
 0x982   :  { %4861 = vmatprep.subr.bf16.mxu0 %v5319_v63 }
 0x985   :  { %4863 = vmatpush3.bf16.msra.mxu0 %v4862_v8 }
 0x986   :  { %4864 = vmatprep.subr.bf16.mxu0 %v5319_v63 }
 0xa53   :  { %v3324_v42 = vpop.f32.mrb[70].mxu0 }
 0xa54   :  { %v4690_v49 = vpop.f32.mrb[71].mxu0  ;;  %4692 = vmatpush3.msk.msra.mxu1 %vm3085_vm3, %v3324_v42 }
 0xa55   :  { %4694 = vmatmul.mubr.msk.f32.vlgmr.msra.gmra.mrb[40].mxu1 %vm3081_vm4, %v6579_v12  ;;  %4696 = vmatprep.subr.mxu1 %v5318_v31 }
 0xa56   :  { %4698 = vmatprep.mubr.msk.f32.mxu1 %vm5320_vm1, %v5318_v31 }
 0xb28   :  { %v3399_v45 = vpop.f32.mrb[40].mxu1 }
 0xb29   :  { %v3403_v28 = vsub.f32 %v3324_v42, %v3399_v45  ;;  %v4695_v46 = vpop.f32.mrb[41].mxu1 }
 0xb2b   :  { %v3404_v43 = vmul.f32 %v3403_v28, %v3403_v28 }
 0xb2d   :  { %4697 = vmatpush3.msk.msra.mxu1 %vm3085_vm3, %v3404_v43 }
 0xb2e   :  { %4699 = vmatmul.mubr.msk.f32.vlgmr.msra.gmra.mrb[42].mxu1 %vm3081_vm4, %v6579_v12  ;;  %4712 = vmatprep.subr.mxu1 %v5318_v31 }
 0xb2f   :  { %4714 = vmatprep.mubr.msk.f32.mxu1 %vm5320_vm1, %v5318_v31 }
 0xc01   :  { %v3474_v53 = vpop.f32.mrb[42].mxu1 }
 0xc02   :  { %v3475_v54 = vadd.f32 1e-05, %v3474_v53  ;;  %v4700_v55 = vpop.f32.mrb[43].mxu1 }
 0xc04   :  { %5307 = vrsqrt.f32 %v3475_v54 }
 0xc0e   :  { %v5308_v16 = vpop.eup %5307 }
 0xc0f   :  { %v3479_v57 = vmul.f32 %v5308_v16, %v3403_v28 }
 0xc11   :  { %v3486_v17 = vmul.f32 %v4483_v56, %v3479_v57 }
 0xc13   :  { %v3493_v61 = vadd.f32 %v4484_v58, %v3486_v17 }
 0xc15   :  { %v3494_v62 = vmax.f32 %v3493_v61, 0.0 }
 0xc17   :  { %4710 = vmatmul.mubr.msk.f32.vlgmr.msra.gmra.mrb[72].mxu0 %vm3005_vm2, %v3494_v62 }
 0xc18   :  { %4730 = vmatprep.mubr.msk.f32.mxu0 %vm5320_vm1, %v5318_v31  ;;  %4866 = vmatpush3.bf16.msra.mxu0 %v4865_v4 }
 0xc19   :  { %4867 = vmatprep.subr.bf16.mxu0 %v5319_v63 }
 0xc1c   :  { %4869 = vmatpush3.bf16.msra.mxu0 %v4868_v5 }
 0xc1d   :  { %4870 = vmatprep.subr.bf16.mxu0 %v5319_v63 }
 0xcea   :  { %v3568_v21 = vpop.f32.mrb[72].mxu0 }
 0xceb   :  { %v4711_v0 = vpop.f32.mrb[73].mxu0  ;;  %4713 = vmatpush3.msk.msra.mxu1 %vm3085_vm3, %v3568_v21 }
 0xcec   :  { %4715 = vmatmul.mubr.msk.f32.vlgmr.msra.gmra.mrb[44].mxu1 %vm3081_vm4, %v6579_v12  ;;  %4717 = vmatprep.subr.mxu1 %v5318_v31 }
 0xced   :  { %4719 = vmatprep.mubr.msk.f32.mxu1 %vm5320_vm1, %v5318_v31 }
 0xdbf   :  { %v3643_v1 = vpop.f32.mrb[44].mxu1 }
 0xdc0   :  { %v3647_v60 = vsub.f32 %v3568_v21, %v3643_v1  ;;  %v4716_v2 = vpop.f32.mrb[45].mxu1 }
 0xdc2   :  { %v3648_v3 = vmul.f32 %v3647_v60, %v3647_v60 }
 0xdc4   :  { %4718 = vmatpush3.msk.msra.mxu1 %vm3085_vm3, %v3648_v3 }
 0xdc5   :  { %4720 = vmatmul.mubr.msk.f32.vlgmr.msra.gmra.mrb[46].mxu1 %vm3081_vm4, %v6579_v12  ;;  %4733 = vmatprep.subr.mxu1 %v5318_v31 }
 0xdc6   :  { %4735 = vmatprep.mubr.msk.f32.mxu1 %vm5320_vm1, %v5318_v31 }
 0xe98   :  { %v3718_v6 = vpop.f32.mrb[46].mxu1 }
 0xe99   :  { %v3719_v7 = vadd.f32 1e-05, %v3718_v6  ;;  %v4721_v9 = vpop.f32.mrb[47].mxu1 }
 0xe9b   :  { %5309 = vrsqrt.f32 %v3719_v7 }
 0xea5   :  { %v5310_v27 = vpop.eup %5309 }
 0xea6   :  { %v3723_v13 = vmul.f32 %v5310_v27, %v3647_v60 }
 0xea8   :  { %v3730_v47 = vmul.f32 %v4490_v48, %v3723_v13 }
 0xeaa   :  { %v3737_v36 = vadd.f32 %v4491_v35, %v3730_v47 }
 0xeac   :  { %4731 = vmatmul.mubr.msk.f32.vlgmr.msra.gmra.mrb[74].mxu0 %vm3005_vm2, %v3737_v36  ;;  %4501 = vst.msk [vmem:[%s6738_s24 + $0x4] sm:$0xf] %vm4065_vm5, %v3737_v36 }
 0xead   :  { %4747 = vmatprep.mubr.msk.f32.mxu0 %vm5320_vm1, %v5318_v31  ;;  %4872 = vmatpush3.bf16.msra.mxu0 %v4871_v22 }
 0xf7f   :  { %v3811_v63 = vpop.f32.mrb[74].mxu0 }
 0xf80   :  { %v4732_v14 = vpop.f32.mrb[75].mxu0  ;;  %4734 = vmatpush3.msk.msra.mxu1 %vm3085_vm3, %v3811_v63 }
 0xf81   :  { %4736 = vmatmul.mubr.msk.f32.vlgmr.msra.gmra.mrb[48].mxu1 %vm3081_vm4, %v6579_v12  ;;  %4738 = vmatprep.subr.mxu1 %v5318_v31 }
 0xf82   :  { %4740 = vmatprep.mubr.msk.f32.mxu1 %vm5320_vm1, %v5318_v31 }
0x1054   :  { %v3886_v37 = vpop.f32.mrb[48].mxu1 }
0x1055   :  { %v3890_v38 = vsub.f32 %v3811_v63, %v3886_v37  ;;  %v4737_v15 = vpop.f32.mrb[49].mxu1 }
0x1057   :  { %v3891_v18 = vmul.f32 %v3890_v38, %v3890_v38 }
0x1059   :  { %4739 = vmatpush3.msk.msra.mxu1 %vm3085_vm3, %v3891_v18 }
0x105a   :  { %4741 = vmatmul.mubr.msk.f32.vlgmr.msra.gmra.mrb[50].mxu1 %vm3081_vm4, %v6579_v12 }
0x112d   :  { %v3961_v31 = vpop.f32.mrb[50].mxu1 }
0x112e   :  { %v3962_v23 = vadd.f32 1e-05, %v3961_v31  ;;  %v4742_v24 = vpop.f32.mrb[51].mxu1 }
0x1130   :  { %5311 = vrsqrt.f32 %v3962_v23 }
0x113a   :  { %v5312_v25 = vpop.eup %5311 }
0x113b   :  { %v3966_v12 = vmul.f32 %v5312_v25, %v3890_v38 }
0x113d   :  { %v3973_v32 = vmul.f32 %v4497_v26, %v3966_v12 }
0x113f   :  { %v3980_v33 = vadd.f32 %v4498_v30, %v3973_v32 }
0x1141   :  { %v3981_v34 = vmax.f32 %v3980_v33, 0.0 }
0x1143   :  { %4748 = vmatmul.mubr.msk.f32.vlgmr.msra.gmra.mrb[76].mxu0 %vm3991_vm6, %v3981_v34 }
0x1216   :  { %v4061_v41 = vpop.f32.mrb[76].mxu0 }
0x1217   :  { %v4062_v42 = vadd.f32 %v4499_v39, %v4061_v41  ;;  %v4749_v49 = vpop.f32.mrb[77].mxu0 }
0x1219   :  { %4066 = vst.msk [vmem:[%s6738_s24] sm:$0xf] %vm4065_vm5, %v4062_v42 }

</bundles_post_ra>
